<compile_context>
chip_gen: v6e
topology: v6e:2x2x1
jax: 0.10.0
libtpu: 0.0.40
codegen_flags: <defaults>
</compile_context>

<pallas_src>
import functools

import jax
import jax.numpy as jnp
from jax.experimental import pallas as pl
from jax.experimental.pallas import tpu as pltpu

LANE = 128           # TPU vreg lane width
SUBLANE_CHUNK = 16   # inner-loop chunk (sublanes): ~20 live vregs, no spills


def scaled_xornet_kernel(w1_ref, b1_ref, w2_ref, b2_ref, x_ref, o_ref):
    """One lane-dense batch block.

    x_ref : (d_in,  S, 128) VMEM  -- feature-major, batch on (sublane, lane), any dtype
    o_ref : (d_out, S, 128) VMEM  -- same dtype as x_ref
    w1_ref (d_hid, d_in), b1_ref (d_hid,), w2_ref (d_out, d_hid), b2_ref (d_out,): SMEM f32
    """
    d_hid, d_in = w1_ref.shape
    d_out = w2_ref.shape[0]
    S = x_ref.shape[1]

    # Chunk size along sublanes: bounds live vregs irrespective of S (S is a multiple of 8).
    ch = SUBLANE_CHUNK if S % SUBLANE_CHUNK == 0 else 8
    n_chunks = S // ch

    # Hoist every SMEM scalar read out of the chunk loop (loop-invariant sld).
    w1 = [[w1_ref[j, i] for i in range(d_in)] for j in range(d_hid)]
    b1 = [b1_ref[j] for j in range(d_hid)]
    w2 = [[w2_ref[k, j] for j in range(d_hid)] for k in range(d_out)]
    b2 = [b2_ref[k] for k in range(d_out)]

    @pl.loop(0, n_chunks)
    def _(c):
        r = pl.multiple_of(c * ch, ch)

        # ---- Layer 1 (VPU only): h[j] = relu(b1[j] + sum_i W1[j,i] * x[i]) ----
        xi = x_ref[0, pl.ds(r, ch), :].astype(jnp.float32)   # f32 compute (v5e-safe)
        h = [w1[j][0] * xi for j in range(d_hid)]
        for i in range(1, d_in):
            xi = x_ref[i, pl.ds(r, ch), :].astype(jnp.float32)
            for j in range(d_hid):
                h[j] = h[j] + w1[j][i] * xi
        h = [jnp.maximum(h[j] + b1[j], 0.0) for j in range(d_hid)]

        # ---- Layer 2 (VPU only): o[k] = relu(b2[k] + sum_j W2[k,j] * h[j]) ----
        for k in range(d_out):
            acc = w2[k][0] * h[0]
            for j in range(1, d_hid):
                acc = acc + w2[k][j] * h[j]
            o_ref[k, pl.ds(r, ch), :] = jnp.maximum(acc + b2[k], 0.0).astype(o_ref.dtype)


def _pick_block(groups8, block_sublanes):
    """Choose (S, n_blocks): blocks of up to `block_sublanes` sublanes, but keep >=2
    (ideally 4) blocks when the batch is large enough that each block still has
    >=256 sublanes of work (v7x 2-TC split + double-buffer lookahead)."""
    n_blocks = pl.cdiv(groups8, block_sublanes)
    if n_blocks < 4 and groups8 >= 4 * 256:
        n_blocks = 4
    elif n_blocks < 2 and groups8 >= 2 * 256:
        n_blocks = 2
    n_blocks = max(n_blocks, 1)
    S = pl.cdiv(pl.cdiv(groups8, n_blocks), 8) * 8
    return S, n_blocks


def scaled_xornet_forward_feature_major(x_arr, w1, b1, w2, b2, *, block_sublanes=512):
    """Feature-major lane-dense path: x_arr is (d_in, G, 128) with G % 8 == 0.

    Returns (d_out, G, 128) in x_arr.dtype.  Use this entry point to keep activations
    in the lane-dense layout end-to-end and skip the wrapper-side transposes.
    """
    d_in, G, lane = x_arr.shape
    assert lane == LANE and G % 8 == 0
    d_out = w2.shape[0]

    S, n_blocks = _pick_block(G, block_sublanes)
    g_pad = n_blocks * S
    if g_pad != G:
        x_arr = jnp.pad(x_arr, ((0, 0), (0, g_pad - G), (0, 0)))

    smem = pl.BlockSpec(memory_space=pltpu.MemorySpace.SMEM)
    out_arr = pl.pallas_call(
        scaled_xornet_kernel,
        out_shape=jax.ShapeDtypeStruct((d_out, g_pad, LANE), x_arr.dtype),
        grid=(n_blocks,),
        in_specs=[
            smem,                                                 # w1 (d_hid, d_in)
            smem,                                                 # b1 (d_hid,)
            smem,                                                 # w2 (d_out, d_hid)
            smem,                                                 # b2 (d_out,)
            # Default double-buffering; switch to pipeline_mode=pl.Buffered(3) only if
            # profiling shows the x DMA exposed after bf16 + large blocks.
            pl.BlockSpec((d_in, S, LANE), lambda t: (0, t, 0)),   # x slabs
        ],
        out_specs=pl.BlockSpec((d_out, S, LANE), lambda t: (0, t, 0)),
        compiler_params=pltpu.CompilerParams(
            dimension_semantics=("parallel",),  # v7x: shard batch blocks across both TCs
        ),
    )(
        w1.astype(jnp.float32), b1.astype(jnp.float32),
        w2.astype(jnp.float32), b2.astype(jnp.float32),
        x_arr,
    )
    return out_arr[:, :G, :]


@functools.partial(jax.jit, static_argnames=("block_sublanes",))
def scaled_xornet_forward(x, w1, b1, w2, b2, *, block_sublanes=512):
    """relu(relu(x @ w1.T + b1) @ w2.T + b2) for x of shape (B, 2n).

    Activations transit HBM in x.dtype (pass bf16 to halve DMA bytes; compute stays f32
    inside the kernel).  Output dtype == x.dtype.
    """
    B, d_in = x.shape
    d_out = w2.shape[0]

    groups = pl.cdiv(max(B, 1), LANE)            # B == 0 guarded
    groups8 = pl.cdiv(groups, 8) * 8
    b_pad = groups8 * LANE

    # One layout-plumbing step (pad + transpose + reshape, fused by XLA) in x.dtype —
    # no forced f32 upcast.  x_arr[i, g, l] == x[g*128 + l, i].
    x_pad = x if b_pad == B else jnp.pad(x, ((0, b_pad - B), (0, 0)))
    x_arr = x_pad.T.reshape(d_in, groups8, LANE)

    out_arr = scaled_xornet_forward_feature_major(
        x_arr, w1, b1, w2, b2, block_sublanes=block_sublanes)

    # Back to [batch, features]; drop zero-padding rows.
    return out_arr.reshape(d_out, b_pad).T[:B]


def reference_forward(x, w1, b1, w2, b2):
    h = jnp.maximum(
        jnp.dot(x, w1.T, precision=jax.lax.Precision.HIGHEST) + b1, 0.0)
    return jnp.maximum(
        jnp.dot(h, w2.T, precision=jax.lax.Precision.HIGHEST) + b2, 0.0)


if __name__ == "__main__":
    # ScaledXORNet(n=6, m=8): hidden = Linear(12, 8), output = Linear(8, 6).
    n, m = 6, 8
    d_in, d_hid, d_out = 2 * n, m, n
    B = 8

    key = jax.random.PRNGKey(0)
    kx, k1, k2, k3, k4 = jax.random.split(key, 5)
    x = jax.random.uniform(kx, (B, d_in), dtype=jnp.float32)
    w1 = jax.random.normal(k1, (d_hid, d_in), dtype=jnp.float32) * 0.5
    b1 = jax.random.normal(k2, (d_hid,), dtype=jnp.float32) * 0.1
    w2 = jax.random.normal(k3, (d_out, d_hid), dtype=jnp.float32) * 0.5
    b2 = jax.random.normal(k4, (d_out,), dtype=jnp.float32) * 0.1

    out = scaled_xornet_forward(x, w1, b1, w2, b2)
    out = jax.block_until_ready(out)

    ref = reference_forward(x, w1, b1, w2, b2)
    assert out.shape == (B, d_out)
    assert out.dtype == x.dtype
    assert jnp.allclose(out, ref, atol=1e-5, rtol=1e-5)

    print("KERNEL_OK")
</pallas_src>

<mosaic_0001>
module attributes {stable_mosaic.version = 11 : i64} {
  func.func @scaled_xornet_kernel(%arg0: i32, %arg1: memref<8x12xf32, #tpu.memory_space<smem>>, %arg2: memref<8xf32, #tpu.memory_space<smem>>, %arg3: memref<6x8xf32, #tpu.memory_space<smem>>, %arg4: memref<6xf32, #tpu.memory_space<smem>>, %arg5: memref<12x8x128xf32, #tpu.memory_space<vmem>>, %arg6: memref<6x8x128xf32, #tpu.memory_space<vmem>>) attributes {dimension_semantics = [#tpu.dimension_semantics<parallel>], iteration_bounds = array<i64: 1>, scalar_prefetch = 0 : i64, scratch_operands = 0 : i64, tpu.core_type = #tpu.core_type<tc>, window_params = [{transform_indices = @transform_0, window_bounds = array<i64: 8, 12>}, {transform_indices = @transform_1, window_bounds = array<i64: 8>}, {transform_indices = @transform_2, window_bounds = array<i64: 6, 8>}, {transform_indices = @transform_3, window_bounds = array<i64: 6>}, {transform_indices = @transform_4, window_bounds = array<i64: 12, 8, 128>}, {transform_indices = @transform_5, window_bounds = array<i64: 6, 8, 128>}]} {
    %c0 = arith.constant 0 : index
    %c0_0 = arith.constant 0 : index
    %0 = memref.load %arg1[%c0, %c0_0] : memref<8x12xf32, #tpu.memory_space<smem>>
    %c0_1 = arith.constant 0 : index
    %c1 = arith.constant 1 : index
    %1 = memref.load %arg1[%c0_1, %c1] : memref<8x12xf32, #tpu.memory_space<smem>>
    %c0_2 = arith.constant 0 : index
    %c2 = arith.constant 2 : index
    %2 = memref.load %arg1[%c0_2, %c2] : memref<8x12xf32, #tpu.memory_space<smem>>
    %c0_3 = arith.constant 0 : index
    %c3 = arith.constant 3 : index
    %3 = memref.load %arg1[%c0_3, %c3] : memref<8x12xf32, #tpu.memory_space<smem>>
    %c0_4 = arith.constant 0 : index
    %c4 = arith.constant 4 : index
    %4 = memref.load %arg1[%c0_4, %c4] : memref<8x12xf32, #tpu.memory_space<smem>>
    %c0_5 = arith.constant 0 : index
    %c5 = arith.constant 5 : index
    %5 = memref.load %arg1[%c0_5, %c5] : memref<8x12xf32, #tpu.memory_space<smem>>
    %c0_6 = arith.constant 0 : index
    %c6 = arith.constant 6 : index
    %6 = memref.load %arg1[%c0_6, %c6] : memref<8x12xf32, #tpu.memory_space<smem>>
    %c0_7 = arith.constant 0 : index
    %c7 = arith.constant 7 : index
    %7 = memref.load %arg1[%c0_7, %c7] : memref<8x12xf32, #tpu.memory_space<smem>>
    %c0_8 = arith.constant 0 : index
    %c8 = arith.constant 8 : index
    %8 = memref.load %arg1[%c0_8, %c8] : memref<8x12xf32, #tpu.memory_space<smem>>
    %c0_9 = arith.constant 0 : index
    %c9 = arith.constant 9 : index
    %9 = memref.load %arg1[%c0_9, %c9] : memref<8x12xf32, #tpu.memory_space<smem>>
    %c0_10 = arith.constant 0 : index
    %c10 = arith.constant 10 : index
    %10 = memref.load %arg1[%c0_10, %c10] : memref<8x12xf32, #tpu.memory_space<smem>>
    %c0_11 = arith.constant 0 : index
    %c11 = arith.constant 11 : index
    %11 = memref.load %arg1[%c0_11, %c11] : memref<8x12xf32, #tpu.memory_space<smem>>
    %c1_12 = arith.constant 1 : index
    %c0_13 = arith.constant 0 : index
    %12 = memref.load %arg1[%c1_12, %c0_13] : memref<8x12xf32, #tpu.memory_space<smem>>
    %c1_14 = arith.constant 1 : index
    %c1_15 = arith.constant 1 : index
    %13 = memref.load %arg1[%c1_14, %c1_15] : memref<8x12xf32, #tpu.memory_space<smem>>
    %c1_16 = arith.constant 1 : index
    %c2_17 = arith.constant 2 : index
    %14 = memref.load %arg1[%c1_16, %c2_17] : memref<8x12xf32, #tpu.memory_space<smem>>
    %c1_18 = arith.constant 1 : index
    %c3_19 = arith.constant 3 : index
    %15 = memref.load %arg1[%c1_18, %c3_19] : memref<8x12xf32, #tpu.memory_space<smem>>
    %c1_20 = arith.constant 1 : index
    %c4_21 = arith.constant 4 : index
    %16 = memref.load %arg1[%c1_20, %c4_21] : memref<8x12xf32, #tpu.memory_space<smem>>
    %c1_22 = arith.constant 1 : index
    %c5_23 = arith.constant 5 : index
    %17 = memref.load %arg1[%c1_22, %c5_23] : memref<8x12xf32, #tpu.memory_space<smem>>
    %c1_24 = arith.constant 1 : index
    %c6_25 = arith.constant 6 : index
    %18 = memref.load %arg1[%c1_24, %c6_25] : memref<8x12xf32, #tpu.memory_space<smem>>
    %c1_26 = arith.constant 1 : index
    %c7_27 = arith.constant 7 : index
    %19 = memref.load %arg1[%c1_26, %c7_27] : memref<8x12xf32, #tpu.memory_space<smem>>
    %c1_28 = arith.constant 1 : index
    %c8_29 = arith.constant 8 : index
    %20 = memref.load %arg1[%c1_28, %c8_29] : memref<8x12xf32, #tpu.memory_space<smem>>
    %c1_30 = arith.constant 1 : index
    %c9_31 = arith.constant 9 : index
    %21 = memref.load %arg1[%c1_30, %c9_31] : memref<8x12xf32, #tpu.memory_space<smem>>
    %c1_32 = arith.constant 1 : index
    %c10_33 = arith.constant 10 : index
    %22 = memref.load %arg1[%c1_32, %c10_33] : memref<8x12xf32, #tpu.memory_space<smem>>
    %c1_34 = arith.constant 1 : index
    %c11_35 = arith.constant 11 : index
    %23 = memref.load %arg1[%c1_34, %c11_35] : memref<8x12xf32, #tpu.memory_space<smem>>
    %c2_36 = arith.constant 2 : index
    %c0_37 = arith.constant 0 : index
    %24 = memref.load %arg1[%c2_36, %c0_37] : memref<8x12xf32, #tpu.memory_space<smem>>
    %c2_38 = arith.constant 2 : index
    %c1_39 = arith.constant 1 : index
    %25 = memref.load %arg1[%c2_38, %c1_39] : memref<8x12xf32, #tpu.memory_space<smem>>
    %c2_40 = arith.constant 2 : index
    %c2_41 = arith.constant 2 : index
    %26 = memref.load %arg1[%c2_40, %c2_41] : memref<8x12xf32, #tpu.memory_space<smem>>
    %c2_42 = arith.constant 2 : index
    %c3_43 = arith.constant 3 : index
    %27 = memref.load %arg1[%c2_42, %c3_43] : memref<8x12xf32, #tpu.memory_space<smem>>
    %c2_44 = arith.constant 2 : index
    %c4_45 = arith.constant 4 : index
    %28 = memref.load %arg1[%c2_44, %c4_45] : memref<8x12xf32, #tpu.memory_space<smem>>
    %c2_46 = arith.constant 2 : index
    %c5_47 = arith.constant 5 : index
    %29 = memref.load %arg1[%c2_46, %c5_47] : memref<8x12xf32, #tpu.memory_space<smem>>
    %c2_48 = arith.constant 2 : index
    %c6_49 = arith.constant 6 : index
    %30 = memref.load %arg1[%c2_48, %c6_49] : memref<8x12xf32, #tpu.memory_space<smem>>
    %c2_50 = arith.constant 2 : index
    %c7_51 = arith.constant 7 : index
    %31 = memref.load %arg1[%c2_50, %c7_51] : memref<8x12xf32, #tpu.memory_space<smem>>
    %c2_52 = arith.constant 2 : index
    %c8_53 = arith.constant 8 : index
    %32 = memref.load %arg1[%c2_52, %c8_53] : memref<8x12xf32, #tpu.memory_space<smem>>
    %c2_54 = arith.constant 2 : index
    %c9_55 = arith.constant 9 : index
    %33 = memref.load %arg1[%c2_54, %c9_55] : memref<8x12xf32, #tpu.memory_space<smem>>
    %c2_56 = arith.constant 2 : index
    %c10_57 = arith.constant 10 : index
    %34 = memref.load %arg1[%c2_56, %c10_57] : memref<8x12xf32, #tpu.memory_space<smem>>
    %c2_58 = arith.constant 2 : index
    %c11_59 = arith.constant 11 : index
    %35 = memref.load %arg1[%c2_58, %c11_59] : memref<8x12xf32, #tpu.memory_space<smem>>
    %c3_60 = arith.constant 3 : index
    %c0_61 = arith.constant 0 : index
    %36 = memref.load %arg1[%c3_60, %c0_61] : memref<8x12xf32, #tpu.memory_space<smem>>
    %c3_62 = arith.constant 3 : index
    %c1_63 = arith.constant 1 : index
    %37 = memref.load %arg1[%c3_62, %c1_63] : memref<8x12xf32, #tpu.memory_space<smem>>
    %c3_64 = arith.constant 3 : index
    %c2_65 = arith.constant 2 : index
    %38 = memref.load %arg1[%c3_64, %c2_65] : memref<8x12xf32, #tpu.memory_space<smem>>
    %c3_66 = arith.constant 3 : index
    %c3_67 = arith.constant 3 : index
    %39 = memref.load %arg1[%c3_66, %c3_67] : memref<8x12xf32, #tpu.memory_space<smem>>
    %c3_68 = arith.constant 3 : index
    %c4_69 = arith.constant 4 : index
    %40 = memref.load %arg1[%c3_68, %c4_69] : memref<8x12xf32, #tpu.memory_space<smem>>
    %c3_70 = arith.constant 3 : index
    %c5_71 = arith.constant 5 : index
    %41 = memref.load %arg1[%c3_70, %c5_71] : memref<8x12xf32, #tpu.memory_space<smem>>
    %c3_72 = arith.constant 3 : index
    %c6_73 = arith.constant 6 : index
    %42 = memref.load %arg1[%c3_72, %c6_73] : memref<8x12xf32, #tpu.memory_space<smem>>
    %c3_74 = arith.constant 3 : index
    %c7_75 = arith.constant 7 : index
    %43 = memref.load %arg1[%c3_74, %c7_75] : memref<8x12xf32, #tpu.memory_space<smem>>
    %c3_76 = arith.constant 3 : index
    %c8_77 = arith.constant 8 : index
    %44 = memref.load %arg1[%c3_76, %c8_77] : memref<8x12xf32, #tpu.memory_space<smem>>
    %c3_78 = arith.constant 3 : index
    %c9_79 = arith.constant 9 : index
    %45 = memref.load %arg1[%c3_78, %c9_79] : memref<8x12xf32, #tpu.memory_space<smem>>
    %c3_80 = arith.constant 3 : index
    %c10_81 = arith.constant 10 : index
    %46 = memref.load %arg1[%c3_80, %c10_81] : memref<8x12xf32, #tpu.memory_space<smem>>
    %c3_82 = arith.constant 3 : index
    %c11_83 = arith.constant 11 : index
    %47 = memref.load %arg1[%c3_82, %c11_83] : memref<8x12xf32, #tpu.memory_space<smem>>
    %c4_84 = arith.constant 4 : index
    %c0_85 = arith.constant 0 : index
    %48 = memref.load %arg1[%c4_84, %c0_85] : memref<8x12xf32, #tpu.memory_space<smem>>
    %c4_86 = arith.constant 4 : index
    %c1_87 = arith.constant 1 : index
    %49 = memref.load %arg1[%c4_86, %c1_87] : memref<8x12xf32, #tpu.memory_space<smem>>
    %c4_88 = arith.constant 4 : index
    %c2_89 = arith.constant 2 : index
    %50 = memref.load %arg1[%c4_88, %c2_89] : memref<8x12xf32, #tpu.memory_space<smem>>
    %c4_90 = arith.constant 4 : index
    %c3_91 = arith.constant 3 : index
    %51 = memref.load %arg1[%c4_90, %c3_91] : memref<8x12xf32, #tpu.memory_space<smem>>
    %c4_92 = arith.constant 4 : index
    %c4_93 = arith.constant 4 : index
    %52 = memref.load %arg1[%c4_92, %c4_93] : memref<8x12xf32, #tpu.memory_space<smem>>
    %c4_94 = arith.constant 4 : index
    %c5_95 = arith.constant 5 : index
    %53 = memref.load %arg1[%c4_94, %c5_95] : memref<8x12xf32, #tpu.memory_space<smem>>
    %c4_96 = arith.constant 4 : index
    %c6_97 = arith.constant 6 : index
    %54 = memref.load %arg1[%c4_96, %c6_97] : memref<8x12xf32, #tpu.memory_space<smem>>
    %c4_98 = arith.constant 4 : index
    %c7_99 = arith.constant 7 : index
    %55 = memref.load %arg1[%c4_98, %c7_99] : memref<8x12xf32, #tpu.memory_space<smem>>
    %c4_100 = arith.constant 4 : index
    %c8_101 = arith.constant 8 : index
    %56 = memref.load %arg1[%c4_100, %c8_101] : memref<8x12xf32, #tpu.memory_space<smem>>
    %c4_102 = arith.constant 4 : index
    %c9_103 = arith.constant 9 : index
    %57 = memref.load %arg1[%c4_102, %c9_103] : memref<8x12xf32, #tpu.memory_space<smem>>
    %c4_104 = arith.constant 4 : index
    %c10_105 = arith.constant 10 : index
    %58 = memref.load %arg1[%c4_104, %c10_105] : memref<8x12xf32, #tpu.memory_space<smem>>
    %c4_106 = arith.constant 4 : index
    %c11_107 = arith.constant 11 : index
    %59 = memref.load %arg1[%c4_106, %c11_107] : memref<8x12xf32, #tpu.memory_space<smem>>
    %c5_108 = arith.constant 5 : index
    %c0_109 = arith.constant 0 : index
    %60 = memref.load %arg1[%c5_108, %c0_109] : memref<8x12xf32, #tpu.memory_space<smem>>
    %c5_110 = arith.constant 5 : index
    %c1_111 = arith.constant 1 : index
    %61 = memref.load %arg1[%c5_110, %c1_111] : memref<8x12xf32, #tpu.memory_space<smem>>
    %c5_112 = arith.constant 5 : index
    %c2_113 = arith.constant 2 : index
    %62 = memref.load %arg1[%c5_112, %c2_113] : memref<8x12xf32, #tpu.memory_space<smem>>
    %c5_114 = arith.constant 5 : index
    %c3_115 = arith.constant 3 : index
    %63 = memref.load %arg1[%c5_114, %c3_115] : memref<8x12xf32, #tpu.memory_space<smem>>
    %c5_116 = arith.constant 5 : index
    %c4_117 = arith.constant 4 : index
    %64 = memref.load %arg1[%c5_116, %c4_117] : memref<8x12xf32, #tpu.memory_space<smem>>
    %c5_118 = arith.constant 5 : index
    %c5_119 = arith.constant 5 : index
    %65 = memref.load %arg1[%c5_118, %c5_119] : memref<8x12xf32, #tpu.memory_space<smem>>
    %c5_120 = arith.constant 5 : index
    %c6_121 = arith.constant 6 : index
    %66 = memref.load %arg1[%c5_120, %c6_121] : memref<8x12xf32, #tpu.memory_space<smem>>
    %c5_122 = arith.constant 5 : index
    %c7_123 = arith.constant 7 : index
    %67 = memref.load %arg1[%c5_122, %c7_123] : memref<8x12xf32, #tpu.memory_space<smem>>
    %c5_124 = arith.constant 5 : index
    %c8_125 = arith.constant 8 : index
    %68 = memref.load %arg1[%c5_124, %c8_125] : memref<8x12xf32, #tpu.memory_space<smem>>
    %c5_126 = arith.constant 5 : index
    %c9_127 = arith.constant 9 : index
    %69 = memref.load %arg1[%c5_126, %c9_127] : memref<8x12xf32, #tpu.memory_space<smem>>
    %c5_128 = arith.constant 5 : index
    %c10_129 = arith.constant 10 : index
    %70 = memref.load %arg1[%c5_128, %c10_129] : memref<8x12xf32, #tpu.memory_space<smem>>
    %c5_130 = arith.constant 5 : index
    %c11_131 = arith.constant 11 : index
    %71 = memref.load %arg1[%c5_130, %c11_131] : memref<8x12xf32, #tpu.memory_space<smem>>
    %c6_132 = arith.constant 6 : index
    %c0_133 = arith.constant 0 : index
    %72 = memref.load %arg1[%c6_132, %c0_133] : memref<8x12xf32, #tpu.memory_space<smem>>
    %c6_134 = arith.constant 6 : index
    %c1_135 = arith.constant 1 : index
    %73 = memref.load %arg1[%c6_134, %c1_135] : memref<8x12xf32, #tpu.memory_space<smem>>
    %c6_136 = arith.constant 6 : index
    %c2_137 = arith.constant 2 : index
    %74 = memref.load %arg1[%c6_136, %c2_137] : memref<8x12xf32, #tpu.memory_space<smem>>
    %c6_138 = arith.constant 6 : index
    %c3_139 = arith.constant 3 : index
    %75 = memref.load %arg1[%c6_138, %c3_139] : memref<8x12xf32, #tpu.memory_space<smem>>
    %c6_140 = arith.constant 6 : index
    %c4_141 = arith.constant 4 : index
    %76 = memref.load %arg1[%c6_140, %c4_141] : memref<8x12xf32, #tpu.memory_space<smem>>
    %c6_142 = arith.constant 6 : index
    %c5_143 = arith.constant 5 : index
    %77 = memref.load %arg1[%c6_142, %c5_143] : memref<8x12xf32, #tpu.memory_space<smem>>
    %c6_144 = arith.constant 6 : index
    %c6_145 = arith.constant 6 : index
    %78 = memref.load %arg1[%c6_144, %c6_145] : memref<8x12xf32, #tpu.memory_space<smem>>
    %c6_146 = arith.constant 6 : index
    %c7_147 = arith.constant 7 : index
    %79 = memref.load %arg1[%c6_146, %c7_147] : memref<8x12xf32, #tpu.memory_space<smem>>
    %c6_148 = arith.constant 6 : index
    %c8_149 = arith.constant 8 : index
    %80 = memref.load %arg1[%c6_148, %c8_149] : memref<8x12xf32, #tpu.memory_space<smem>>
    %c6_150 = arith.constant 6 : index
    %c9_151 = arith.constant 9 : index
    %81 = memref.load %arg1[%c6_150, %c9_151] : memref<8x12xf32, #tpu.memory_space<smem>>
    %c6_152 = arith.constant 6 : index
    %c10_153 = arith.constant 10 : index
    %82 = memref.load %arg1[%c6_152, %c10_153] : memref<8x12xf32, #tpu.memory_space<smem>>
    %c6_154 = arith.constant 6 : index
    %c11_155 = arith.constant 11 : index
    %83 = memref.load %arg1[%c6_154, %c11_155] : memref<8x12xf32, #tpu.memory_space<smem>>
    %c7_156 = arith.constant 7 : index
    %c0_157 = arith.constant 0 : index
    %84 = memref.load %arg1[%c7_156, %c0_157] : memref<8x12xf32, #tpu.memory_space<smem>>
    %c7_158 = arith.constant 7 : index
    %c1_159 = arith.constant 1 : index
    %85 = memref.load %arg1[%c7_158, %c1_159] : memref<8x12xf32, #tpu.memory_space<smem>>
    %c7_160 = arith.constant 7 : index
    %c2_161 = arith.constant 2 : index
    %86 = memref.load %arg1[%c7_160, %c2_161] : memref<8x12xf32, #tpu.memory_space<smem>>
    %c7_162 = arith.constant 7 : index
    %c3_163 = arith.constant 3 : index
    %87 = memref.load %arg1[%c7_162, %c3_163] : memref<8x12xf32, #tpu.memory_space<smem>>
    %c7_164 = arith.constant 7 : index
    %c4_165 = arith.constant 4 : index
    %88 = memref.load %arg1[%c7_164, %c4_165] : memref<8x12xf32, #tpu.memory_space<smem>>
    %c7_166 = arith.constant 7 : index
    %c5_167 = arith.constant 5 : index
    %89 = memref.load %arg1[%c7_166, %c5_167] : memref<8x12xf32, #tpu.memory_space<smem>>
    %c7_168 = arith.constant 7 : index
    %c6_169 = arith.constant 6 : index
    %90 = memref.load %arg1[%c7_168, %c6_169] : memref<8x12xf32, #tpu.memory_space<smem>>
    %c7_170 = arith.constant 7 : index
    %c7_171 = arith.constant 7 : index
    %91 = memref.load %arg1[%c7_170, %c7_171] : memref<8x12xf32, #tpu.memory_space<smem>>
    %c7_172 = arith.constant 7 : index
    %c8_173 = arith.constant 8 : index
    %92 = memref.load %arg1[%c7_172, %c8_173] : memref<8x12xf32, #tpu.memory_space<smem>>
    %c7_174 = arith.constant 7 : index
    %c9_175 = arith.constant 9 : index
    %93 = memref.load %arg1[%c7_174, %c9_175] : memref<8x12xf32, #tpu.memory_space<smem>>
    %c7_176 = arith.constant 7 : index
    %c10_177 = arith.constant 10 : index
    %94 = memref.load %arg1[%c7_176, %c10_177] : memref<8x12xf32, #tpu.memory_space<smem>>
    %c7_178 = arith.constant 7 : index
    %c11_179 = arith.constant 11 : index
    %95 = memref.load %arg1[%c7_178, %c11_179] : memref<8x12xf32, #tpu.memory_space<smem>>
    %c0_180 = arith.constant 0 : index
    %96 = memref.load %arg2[%c0_180] : memref<8xf32, #tpu.memory_space<smem>>
    %c1_181 = arith.constant 1 : index
    %97 = memref.load %arg2[%c1_181] : memref<8xf32, #tpu.memory_space<smem>>
    %c2_182 = arith.constant 2 : index
    %98 = memref.load %arg2[%c2_182] : memref<8xf32, #tpu.memory_space<smem>>
    %c3_183 = arith.constant 3 : index
    %99 = memref.load %arg2[%c3_183] : memref<8xf32, #tpu.memory_space<smem>>
    %c4_184 = arith.constant 4 : index
    %100 = memref.load %arg2[%c4_184] : memref<8xf32, #tpu.memory_space<smem>>
    %c5_185 = arith.constant 5 : index
    %101 = memref.load %arg2[%c5_185] : memref<8xf32, #tpu.memory_space<smem>>
    %c6_186 = arith.constant 6 : index
    %102 = memref.load %arg2[%c6_186] : memref<8xf32, #tpu.memory_space<smem>>
    %c7_187 = arith.constant 7 : index
    %103 = memref.load %arg2[%c7_187] : memref<8xf32, #tpu.memory_space<smem>>
    %c0_188 = arith.constant 0 : index
    %c0_189 = arith.constant 0 : index
    %104 = memref.load %arg3[%c0_188, %c0_189] : memref<6x8xf32, #tpu.memory_space<smem>>
    %c0_190 = arith.constant 0 : index
    %c1_191 = arith.constant 1 : index
    %105 = memref.load %arg3[%c0_190, %c1_191] : memref<6x8xf32, #tpu.memory_space<smem>>
    %c0_192 = arith.constant 0 : index
    %c2_193 = arith.constant 2 : index
    %106 = memref.load %arg3[%c0_192, %c2_193] : memref<6x8xf32, #tpu.memory_space<smem>>
    %c0_194 = arith.constant 0 : index
    %c3_195 = arith.constant 3 : index
    %107 = memref.load %arg3[%c0_194, %c3_195] : memref<6x8xf32, #tpu.memory_space<smem>>
    %c0_196 = arith.constant 0 : index
    %c4_197 = arith.constant 4 : index
    %108 = memref.load %arg3[%c0_196, %c4_197] : memref<6x8xf32, #tpu.memory_space<smem>>
    %c0_198 = arith.constant 0 : index
    %c5_199 = arith.constant 5 : index
    %109 = memref.load %arg3[%c0_198, %c5_199] : memref<6x8xf32, #tpu.memory_space<smem>>
    %c0_200 = arith.constant 0 : index
    %c6_201 = arith.constant 6 : index
    %110 = memref.load %arg3[%c0_200, %c6_201] : memref<6x8xf32, #tpu.memory_space<smem>>
    %c0_202 = arith.constant 0 : index
    %c7_203 = arith.constant 7 : index
    %111 = memref.load %arg3[%c0_202, %c7_203] : memref<6x8xf32, #tpu.memory_space<smem>>
    %c1_204 = arith.constant 1 : index
    %c0_205 = arith.constant 0 : index
    %112 = memref.load %arg3[%c1_204, %c0_205] : memref<6x8xf32, #tpu.memory_space<smem>>
    %c1_206 = arith.constant 1 : index
    %c1_207 = arith.constant 1 : index
    %113 = memref.load %arg3[%c1_206, %c1_207] : memref<6x8xf32, #tpu.memory_space<smem>>
    %c1_208 = arith.constant 1 : index
    %c2_209 = arith.constant 2 : index
    %114 = memref.load %arg3[%c1_208, %c2_209] : memref<6x8xf32, #tpu.memory_space<smem>>
    %c1_210 = arith.constant 1 : index
    %c3_211 = arith.constant 3 : index
    %115 = memref.load %arg3[%c1_210, %c3_211] : memref<6x8xf32, #tpu.memory_space<smem>>
    %c1_212 = arith.constant 1 : index
    %c4_213 = arith.constant 4 : index
    %116 = memref.load %arg3[%c1_212, %c4_213] : memref<6x8xf32, #tpu.memory_space<smem>>
    %c1_214 = arith.constant 1 : index
    %c5_215 = arith.constant 5 : index
    %117 = memref.load %arg3[%c1_214, %c5_215] : memref<6x8xf32, #tpu.memory_space<smem>>
    %c1_216 = arith.constant 1 : index
    %c6_217 = arith.constant 6 : index
    %118 = memref.load %arg3[%c1_216, %c6_217] : memref<6x8xf32, #tpu.memory_space<smem>>
    %c1_218 = arith.constant 1 : index
    %c7_219 = arith.constant 7 : index
    %119 = memref.load %arg3[%c1_218, %c7_219] : memref<6x8xf32, #tpu.memory_space<smem>>
    %c2_220 = arith.constant 2 : index
    %c0_221 = arith.constant 0 : index
    %120 = memref.load %arg3[%c2_220, %c0_221] : memref<6x8xf32, #tpu.memory_space<smem>>
    %c2_222 = arith.constant 2 : index
    %c1_223 = arith.constant 1 : index
    %121 = memref.load %arg3[%c2_222, %c1_223] : memref<6x8xf32, #tpu.memory_space<smem>>
    %c2_224 = arith.constant 2 : index
    %c2_225 = arith.constant 2 : index
    %122 = memref.load %arg3[%c2_224, %c2_225] : memref<6x8xf32, #tpu.memory_space<smem>>
    %c2_226 = arith.constant 2 : index
    %c3_227 = arith.constant 3 : index
    %123 = memref.load %arg3[%c2_226, %c3_227] : memref<6x8xf32, #tpu.memory_space<smem>>
    %c2_228 = arith.constant 2 : index
    %c4_229 = arith.constant 4 : index
    %124 = memref.load %arg3[%c2_228, %c4_229] : memref<6x8xf32, #tpu.memory_space<smem>>
    %c2_230 = arith.constant 2 : index
    %c5_231 = arith.constant 5 : index
    %125 = memref.load %arg3[%c2_230, %c5_231] : memref<6x8xf32, #tpu.memory_space<smem>>
    %c2_232 = arith.constant 2 : index
    %c6_233 = arith.constant 6 : index
    %126 = memref.load %arg3[%c2_232, %c6_233] : memref<6x8xf32, #tpu.memory_space<smem>>
    %c2_234 = arith.constant 2 : index
    %c7_235 = arith.constant 7 : index
    %127 = memref.load %arg3[%c2_234, %c7_235] : memref<6x8xf32, #tpu.memory_space<smem>>
    %c3_236 = arith.constant 3 : index
    %c0_237 = arith.constant 0 : index
    %128 = memref.load %arg3[%c3_236, %c0_237] : memref<6x8xf32, #tpu.memory_space<smem>>
    %c3_238 = arith.constant 3 : index
    %c1_239 = arith.constant 1 : index
    %129 = memref.load %arg3[%c3_238, %c1_239] : memref<6x8xf32, #tpu.memory_space<smem>>
    %c3_240 = arith.constant 3 : index
    %c2_241 = arith.constant 2 : index
    %130 = memref.load %arg3[%c3_240, %c2_241] : memref<6x8xf32, #tpu.memory_space<smem>>
    %c3_242 = arith.constant 3 : index
    %c3_243 = arith.constant 3 : index
    %131 = memref.load %arg3[%c3_242, %c3_243] : memref<6x8xf32, #tpu.memory_space<smem>>
    %c3_244 = arith.constant 3 : index
    %c4_245 = arith.constant 4 : index
    %132 = memref.load %arg3[%c3_244, %c4_245] : memref<6x8xf32, #tpu.memory_space<smem>>
    %c3_246 = arith.constant 3 : index
    %c5_247 = arith.constant 5 : index
    %133 = memref.load %arg3[%c3_246, %c5_247] : memref<6x8xf32, #tpu.memory_space<smem>>
    %c3_248 = arith.constant 3 : index
    %c6_249 = arith.constant 6 : index
    %134 = memref.load %arg3[%c3_248, %c6_249] : memref<6x8xf32, #tpu.memory_space<smem>>
    %c3_250 = arith.constant 3 : index
    %c7_251 = arith.constant 7 : index
    %135 = memref.load %arg3[%c3_250, %c7_251] : memref<6x8xf32, #tpu.memory_space<smem>>
    %c4_252 = arith.constant 4 : index
    %c0_253 = arith.constant 0 : index
    %136 = memref.load %arg3[%c4_252, %c0_253] : memref<6x8xf32, #tpu.memory_space<smem>>
    %c4_254 = arith.constant 4 : index
    %c1_255 = arith.constant 1 : index
    %137 = memref.load %arg3[%c4_254, %c1_255] : memref<6x8xf32, #tpu.memory_space<smem>>
    %c4_256 = arith.constant 4 : index
    %c2_257 = arith.constant 2 : index
    %138 = memref.load %arg3[%c4_256, %c2_257] : memref<6x8xf32, #tpu.memory_space<smem>>
    %c4_258 = arith.constant 4 : index
    %c3_259 = arith.constant 3 : index
    %139 = memref.load %arg3[%c4_258, %c3_259] : memref<6x8xf32, #tpu.memory_space<smem>>
    %c4_260 = arith.constant 4 : index
    %c4_261 = arith.constant 4 : index
    %140 = memref.load %arg3[%c4_260, %c4_261] : memref<6x8xf32, #tpu.memory_space<smem>>
    %c4_262 = arith.constant 4 : index
    %c5_263 = arith.constant 5 : index
    %141 = memref.load %arg3[%c4_262, %c5_263] : memref<6x8xf32, #tpu.memory_space<smem>>
    %c4_264 = arith.constant 4 : index
    %c6_265 = arith.constant 6 : index
    %142 = memref.load %arg3[%c4_264, %c6_265] : memref<6x8xf32, #tpu.memory_space<smem>>
    %c4_266 = arith.constant 4 : index
    %c7_267 = arith.constant 7 : index
    %143 = memref.load %arg3[%c4_266, %c7_267] : memref<6x8xf32, #tpu.memory_space<smem>>
    %c5_268 = arith.constant 5 : index
    %c0_269 = arith.constant 0 : index
    %144 = memref.load %arg3[%c5_268, %c0_269] : memref<6x8xf32, #tpu.memory_space<smem>>
    %c5_270 = arith.constant 5 : index
    %c1_271 = arith.constant 1 : index
    %145 = memref.load %arg3[%c5_270, %c1_271] : memref<6x8xf32, #tpu.memory_space<smem>>
    %c5_272 = arith.constant 5 : index
    %c2_273 = arith.constant 2 : index
    %146 = memref.load %arg3[%c5_272, %c2_273] : memref<6x8xf32, #tpu.memory_space<smem>>
    %c5_274 = arith.constant 5 : index
    %c3_275 = arith.constant 3 : index
    %147 = memref.load %arg3[%c5_274, %c3_275] : memref<6x8xf32, #tpu.memory_space<smem>>
    %c5_276 = arith.constant 5 : index
    %c4_277 = arith.constant 4 : index
    %148 = memref.load %arg3[%c5_276, %c4_277] : memref<6x8xf32, #tpu.memory_space<smem>>
    %c5_278 = arith.constant 5 : index
    %c5_279 = arith.constant 5 : index
    %149 = memref.load %arg3[%c5_278, %c5_279] : memref<6x8xf32, #tpu.memory_space<smem>>
    %c5_280 = arith.constant 5 : index
    %c6_281 = arith.constant 6 : index
    %150 = memref.load %arg3[%c5_280, %c6_281] : memref<6x8xf32, #tpu.memory_space<smem>>
    %c5_282 = arith.constant 5 : index
    %c7_283 = arith.constant 7 : index
    %151 = memref.load %arg3[%c5_282, %c7_283] : memref<6x8xf32, #tpu.memory_space<smem>>
    %c0_284 = arith.constant 0 : index
    %152 = memref.load %arg4[%c0_284] : memref<6xf32, #tpu.memory_space<smem>>
    %c1_285 = arith.constant 1 : index
    %153 = memref.load %arg4[%c1_285] : memref<6xf32, #tpu.memory_space<smem>>
    %c2_286 = arith.constant 2 : index
    %154 = memref.load %arg4[%c2_286] : memref<6xf32, #tpu.memory_space<smem>>
    %c3_287 = arith.constant 3 : index
    %155 = memref.load %arg4[%c3_287] : memref<6xf32, #tpu.memory_space<smem>>
    %c4_288 = arith.constant 4 : index
    %156 = memref.load %arg4[%c4_288] : memref<6xf32, #tpu.memory_space<smem>>
    %c5_289 = arith.constant 5 : index
    %157 = memref.load %arg4[%c5_289] : memref<6xf32, #tpu.memory_space<smem>>
    %c0_i32 = arith.constant 0 : i32
    %c1_i32 = arith.constant 1 : i32
    %158 = arith.muli %c0_i32, %c1_i32 : i32
    %c0_i32_290 = arith.constant 0 : i32
    %159 = arith.addi %c0_i32_290, %158 : i32
    %c8_i32 = arith.constant 8 : i32
    %160 = arith.muli %159, %c8_i32 : i32
    %161 = tpu.assume_multiple %160, 8 : i32
    %c0_291 = arith.constant 0 : index
    %162 = arith.index_cast %161 : i32 to index
    %c0_292 = arith.constant 0 : index
    %163 = vector.load %arg5[%c0_291, %162, %c0_292] : memref<12x8x128xf32, #tpu.memory_space<vmem>>, vector<1x8x128xf32>
    %164 = vector.shape_cast %163 : vector<1x8x128xf32> to vector<8x128xf32>
    %165 = vector.broadcast %0 : f32 to vector<8x128xf32>
    %166 = arith.mulf %165, %164 : vector<8x128xf32>
    %167 = vector.broadcast %12 : f32 to vector<8x128xf32>
    %168 = arith.mulf %167, %164 : vector<8x128xf32>
    %169 = vector.broadcast %24 : f32 to vector<8x128xf32>
    %170 = arith.mulf %169, %164 : vector<8x128xf32>
    %171 = vector.broadcast %36 : f32 to vector<8x128xf32>
    %172 = arith.mulf %171, %164 : vector<8x128xf32>
    %173 = vector.broadcast %48 : f32 to vector<8x128xf32>
    %174 = arith.mulf %173, %164 : vector<8x128xf32>
    %175 = vector.broadcast %60 : f32 to vector<8x128xf32>
    %176 = arith.mulf %175, %164 : vector<8x128xf32>
    %177 = vector.broadcast %72 : f32 to vector<8x128xf32>
    %178 = arith.mulf %177, %164 : vector<8x128xf32>
    %179 = vector.broadcast %84 : f32 to vector<8x128xf32>
    %180 = arith.mulf %179, %164 : vector<8x128xf32>
    %c1_293 = arith.constant 1 : index
    %181 = arith.index_cast %161 : i32 to index
    %c0_294 = arith.constant 0 : index
    %182 = vector.load %arg5[%c1_293, %181, %c0_294] : memref<12x8x128xf32, #tpu.memory_space<vmem>>, vector<1x8x128xf32>
    %183 = vector.shape_cast %182 : vector<1x8x128xf32> to vector<8x128xf32>
    %184 = vector.broadcast %1 : f32 to vector<8x128xf32>
    %185 = arith.mulf %184, %183 : vector<8x128xf32>
    %186 = arith.addf %166, %185 : vector<8x128xf32>
    %187 = vector.broadcast %13 : f32 to vector<8x128xf32>
    %188 = arith.mulf %187, %183 : vector<8x128xf32>
    %189 = arith.addf %168, %188 : vector<8x128xf32>
    %190 = vector.broadcast %25 : f32 to vector<8x128xf32>
    %191 = arith.mulf %190, %183 : vector<8x128xf32>
    %192 = arith.addf %170, %191 : vector<8x128xf32>
    %193 = vector.broadcast %37 : f32 to vector<8x128xf32>
    %194 = arith.mulf %193, %183 : vector<8x128xf32>
    %195 = arith.addf %172, %194 : vector<8x128xf32>
    %196 = vector.broadcast %49 : f32 to vector<8x128xf32>
    %197 = arith.mulf %196, %183 : vector<8x128xf32>
    %198 = arith.addf %174, %197 : vector<8x128xf32>
    %199 = vector.broadcast %61 : f32 to vector<8x128xf32>
    %200 = arith.mulf %199, %183 : vector<8x128xf32>
    %201 = arith.addf %176, %200 : vector<8x128xf32>
    %202 = vector.broadcast %73 : f32 to vector<8x128xf32>
    %203 = arith.mulf %202, %183 : vector<8x128xf32>
    %204 = arith.addf %178, %203 : vector<8x128xf32>
    %205 = vector.broadcast %85 : f32 to vector<8x128xf32>
    %206 = arith.mulf %205, %183 : vector<8x128xf32>
    %207 = arith.addf %180, %206 : vector<8x128xf32>
    %c2_295 = arith.constant 2 : index
    %208 = arith.index_cast %161 : i32 to index
    %c0_296 = arith.constant 0 : index
    %209 = vector.load %arg5[%c2_295, %208, %c0_296] : memref<12x8x128xf32, #tpu.memory_space<vmem>>, vector<1x8x128xf32>
    %210 = vector.shape_cast %209 : vector<1x8x128xf32> to vector<8x128xf32>
    %211 = vector.broadcast %2 : f32 to vector<8x128xf32>
    %212 = arith.mulf %211, %210 : vector<8x128xf32>
    %213 = arith.addf %186, %212 : vector<8x128xf32>
    %214 = vector.broadcast %14 : f32 to vector<8x128xf32>
    %215 = arith.mulf %214, %210 : vector<8x128xf32>
    %216 = arith.addf %189, %215 : vector<8x128xf32>
    %217 = vector.broadcast %26 : f32 to vector<8x128xf32>
    %218 = arith.mulf %217, %210 : vector<8x128xf32>
    %219 = arith.addf %192, %218 : vector<8x128xf32>
    %220 = vector.broadcast %38 : f32 to vector<8x128xf32>
    %221 = arith.mulf %220, %210 : vector<8x128xf32>
    %222 = arith.addf %195, %221 : vector<8x128xf32>
    %223 = vector.broadcast %50 : f32 to vector<8x128xf32>
    %224 = arith.mulf %223, %210 : vector<8x128xf32>
    %225 = arith.addf %198, %224 : vector<8x128xf32>
    %226 = vector.broadcast %62 : f32 to vector<8x128xf32>
    %227 = arith.mulf %226, %210 : vector<8x128xf32>
    %228 = arith.addf %201, %227 : vector<8x128xf32>
    %229 = vector.broadcast %74 : f32 to vector<8x128xf32>
    %230 = arith.mulf %229, %210 : vector<8x128xf32>
    %231 = arith.addf %204, %230 : vector<8x128xf32>
    %232 = vector.broadcast %86 : f32 to vector<8x128xf32>
    %233 = arith.mulf %232, %210 : vector<8x128xf32>
    %234 = arith.addf %207, %233 : vector<8x128xf32>
    %c3_297 = arith.constant 3 : index
    %235 = arith.index_cast %161 : i32 to index
    %c0_298 = arith.constant 0 : index
    %236 = vector.load %arg5[%c3_297, %235, %c0_298] : memref<12x8x128xf32, #tpu.memory_space<vmem>>, vector<1x8x128xf32>
    %237 = vector.shape_cast %236 : vector<1x8x128xf32> to vector<8x128xf32>
    %238 = vector.broadcast %3 : f32 to vector<8x128xf32>
    %239 = arith.mulf %238, %237 : vector<8x128xf32>
    %240 = arith.addf %213, %239 : vector<8x128xf32>
    %241 = vector.broadcast %15 : f32 to vector<8x128xf32>
    %242 = arith.mulf %241, %237 : vector<8x128xf32>
    %243 = arith.addf %216, %242 : vector<8x128xf32>
    %244 = vector.broadcast %27 : f32 to vector<8x128xf32>
    %245 = arith.mulf %244, %237 : vector<8x128xf32>
    %246 = arith.addf %219, %245 : vector<8x128xf32>
    %247 = vector.broadcast %39 : f32 to vector<8x128xf32>
    %248 = arith.mulf %247, %237 : vector<8x128xf32>
    %249 = arith.addf %222, %248 : vector<8x128xf32>
    %250 = vector.broadcast %51 : f32 to vector<8x128xf32>
    %251 = arith.mulf %250, %237 : vector<8x128xf32>
    %252 = arith.addf %225, %251 : vector<8x128xf32>
    %253 = vector.broadcast %63 : f32 to vector<8x128xf32>
    %254 = arith.mulf %253, %237 : vector<8x128xf32>
    %255 = arith.addf %228, %254 : vector<8x128xf32>
    %256 = vector.broadcast %75 : f32 to vector<8x128xf32>
    %257 = arith.mulf %256, %237 : vector<8x128xf32>
    %258 = arith.addf %231, %257 : vector<8x128xf32>
    %259 = vector.broadcast %87 : f32 to vector<8x128xf32>
    %260 = arith.mulf %259, %237 : vector<8x128xf32>
    %261 = arith.addf %234, %260 : vector<8x128xf32>
    %c4_299 = arith.constant 4 : index
    %262 = arith.index_cast %161 : i32 to index
    %c0_300 = arith.constant 0 : index
    %263 = vector.load %arg5[%c4_299, %262, %c0_300] : memref<12x8x128xf32, #tpu.memory_space<vmem>>, vector<1x8x128xf32>
    %264 = vector.shape_cast %263 : vector<1x8x128xf32> to vector<8x128xf32>
    %265 = vector.broadcast %4 : f32 to vector<8x128xf32>
    %266 = arith.mulf %265, %264 : vector<8x128xf32>
    %267 = arith.addf %240, %266 : vector<8x128xf32>
    %268 = vector.broadcast %16 : f32 to vector<8x128xf32>
    %269 = arith.mulf %268, %264 : vector<8x128xf32>
    %270 = arith.addf %243, %269 : vector<8x128xf32>
    %271 = vector.broadcast %28 : f32 to vector<8x128xf32>
    %272 = arith.mulf %271, %264 : vector<8x128xf32>
    %273 = arith.addf %246, %272 : vector<8x128xf32>
    %274 = vector.broadcast %40 : f32 to vector<8x128xf32>
    %275 = arith.mulf %274, %264 : vector<8x128xf32>
    %276 = arith.addf %249, %275 : vector<8x128xf32>
    %277 = vector.broadcast %52 : f32 to vector<8x128xf32>
    %278 = arith.mulf %277, %264 : vector<8x128xf32>
    %279 = arith.addf %252, %278 : vector<8x128xf32>
    %280 = vector.broadcast %64 : f32 to vector<8x128xf32>
    %281 = arith.mulf %280, %264 : vector<8x128xf32>
    %282 = arith.addf %255, %281 : vector<8x128xf32>
    %283 = vector.broadcast %76 : f32 to vector<8x128xf32>
    %284 = arith.mulf %283, %264 : vector<8x128xf32>
    %285 = arith.addf %258, %284 : vector<8x128xf32>
    %286 = vector.broadcast %88 : f32 to vector<8x128xf32>
    %287 = arith.mulf %286, %264 : vector<8x128xf32>
    %288 = arith.addf %261, %287 : vector<8x128xf32>
    %c5_301 = arith.constant 5 : index
    %289 = arith.index_cast %161 : i32 to index
    %c0_302 = arith.constant 0 : index
    %290 = vector.load %arg5[%c5_301, %289, %c0_302] : memref<12x8x128xf32, #tpu.memory_space<vmem>>, vector<1x8x128xf32>
    %291 = vector.shape_cast %290 : vector<1x8x128xf32> to vector<8x128xf32>
    %292 = vector.broadcast %5 : f32 to vector<8x128xf32>
    %293 = arith.mulf %292, %291 : vector<8x128xf32>
    %294 = arith.addf %267, %293 : vector<8x128xf32>
    %295 = vector.broadcast %17 : f32 to vector<8x128xf32>
    %296 = arith.mulf %295, %291 : vector<8x128xf32>
    %297 = arith.addf %270, %296 : vector<8x128xf32>
    %298 = vector.broadcast %29 : f32 to vector<8x128xf32>
    %299 = arith.mulf %298, %291 : vector<8x128xf32>
    %300 = arith.addf %273, %299 : vector<8x128xf32>
    %301 = vector.broadcast %41 : f32 to vector<8x128xf32>
    %302 = arith.mulf %301, %291 : vector<8x128xf32>
    %303 = arith.addf %276, %302 : vector<8x128xf32>
    %304 = vector.broadcast %53 : f32 to vector<8x128xf32>
    %305 = arith.mulf %304, %291 : vector<8x128xf32>
    %306 = arith.addf %279, %305 : vector<8x128xf32>
    %307 = vector.broadcast %65 : f32 to vector<8x128xf32>
    %308 = arith.mulf %307, %291 : vector<8x128xf32>
    %309 = arith.addf %282, %308 : vector<8x128xf32>
    %310 = vector.broadcast %77 : f32 to vector<8x128xf32>
    %311 = arith.mulf %310, %291 : vector<8x128xf32>
    %312 = arith.addf %285, %311 : vector<8x128xf32>
    %313 = vector.broadcast %89 : f32 to vector<8x128xf32>
    %314 = arith.mulf %313, %291 : vector<8x128xf32>
    %315 = arith.addf %288, %314 : vector<8x128xf32>
    %c6_303 = arith.constant 6 : index
    %316 = arith.index_cast %161 : i32 to index
    %c0_304 = arith.constant 0 : index
    %317 = vector.load %arg5[%c6_303, %316, %c0_304] : memref<12x8x128xf32, #tpu.memory_space<vmem>>, vector<1x8x128xf32>
    %318 = vector.shape_cast %317 : vector<1x8x128xf32> to vector<8x128xf32>
    %319 = vector.broadcast %6 : f32 to vector<8x128xf32>
    %320 = arith.mulf %319, %318 : vector<8x128xf32>
    %321 = arith.addf %294, %320 : vector<8x128xf32>
    %322 = vector.broadcast %18 : f32 to vector<8x128xf32>
    %323 = arith.mulf %322, %318 : vector<8x128xf32>
    %324 = arith.addf %297, %323 : vector<8x128xf32>
    %325 = vector.broadcast %30 : f32 to vector<8x128xf32>
    %326 = arith.mulf %325, %318 : vector<8x128xf32>
    %327 = arith.addf %300, %326 : vector<8x128xf32>
    %328 = vector.broadcast %42 : f32 to vector<8x128xf32>
    %329 = arith.mulf %328, %318 : vector<8x128xf32>
    %330 = arith.addf %303, %329 : vector<8x128xf32>
    %331 = vector.broadcast %54 : f32 to vector<8x128xf32>
    %332 = arith.mulf %331, %318 : vector<8x128xf32>
    %333 = arith.addf %306, %332 : vector<8x128xf32>
    %334 = vector.broadcast %66 : f32 to vector<8x128xf32>
    %335 = arith.mulf %334, %318 : vector<8x128xf32>
    %336 = arith.addf %309, %335 : vector<8x128xf32>
    %337 = vector.broadcast %78 : f32 to vector<8x128xf32>
    %338 = arith.mulf %337, %318 : vector<8x128xf32>
    %339 = arith.addf %312, %338 : vector<8x128xf32>
    %340 = vector.broadcast %90 : f32 to vector<8x128xf32>
    %341 = arith.mulf %340, %318 : vector<8x128xf32>
    %342 = arith.addf %315, %341 : vector<8x128xf32>
    %c7_305 = arith.constant 7 : index
    %343 = arith.index_cast %161 : i32 to index
    %c0_306 = arith.constant 0 : index
    %344 = vector.load %arg5[%c7_305, %343, %c0_306] : memref<12x8x128xf32, #tpu.memory_space<vmem>>, vector<1x8x128xf32>
    %345 = vector.shape_cast %344 : vector<1x8x128xf32> to vector<8x128xf32>
    %346 = vector.broadcast %7 : f32 to vector<8x128xf32>
    %347 = arith.mulf %346, %345 : vector<8x128xf32>
    %348 = arith.addf %321, %347 : vector<8x128xf32>
    %349 = vector.broadcast %19 : f32 to vector<8x128xf32>
    %350 = arith.mulf %349, %345 : vector<8x128xf32>
    %351 = arith.addf %324, %350 : vector<8x128xf32>
    %352 = vector.broadcast %31 : f32 to vector<8x128xf32>
    %353 = arith.mulf %352, %345 : vector<8x128xf32>
    %354 = arith.addf %327, %353 : vector<8x128xf32>
    %355 = vector.broadcast %43 : f32 to vector<8x128xf32>
    %356 = arith.mulf %355, %345 : vector<8x128xf32>
    %357 = arith.addf %330, %356 : vector<8x128xf32>
    %358 = vector.broadcast %55 : f32 to vector<8x128xf32>
    %359 = arith.mulf %358, %345 : vector<8x128xf32>
    %360 = arith.addf %333, %359 : vector<8x128xf32>
    %361 = vector.broadcast %67 : f32 to vector<8x128xf32>
    %362 = arith.mulf %361, %345 : vector<8x128xf32>
    %363 = arith.addf %336, %362 : vector<8x128xf32>
    %364 = vector.broadcast %79 : f32 to vector<8x128xf32>
    %365 = arith.mulf %364, %345 : vector<8x128xf32>
    %366 = arith.addf %339, %365 : vector<8x128xf32>
    %367 = vector.broadcast %91 : f32 to vector<8x128xf32>
    %368 = arith.mulf %367, %345 : vector<8x128xf32>
    %369 = arith.addf %342, %368 : vector<8x128xf32>
    %c8_307 = arith.constant 8 : index
    %370 = arith.index_cast %161 : i32 to index
    %c0_308 = arith.constant 0 : index
    %371 = vector.load %arg5[%c8_307, %370, %c0_308] : memref<12x8x128xf32, #tpu.memory_space<vmem>>, vector<1x8x128xf32>
    %372 = vector.shape_cast %371 : vector<1x8x128xf32> to vector<8x128xf32>
    %373 = vector.broadcast %8 : f32 to vector<8x128xf32>
    %374 = arith.mulf %373, %372 : vector<8x128xf32>
    %375 = arith.addf %348, %374 : vector<8x128xf32>
    %376 = vector.broadcast %20 : f32 to vector<8x128xf32>
    %377 = arith.mulf %376, %372 : vector<8x128xf32>
    %378 = arith.addf %351, %377 : vector<8x128xf32>
    %379 = vector.broadcast %32 : f32 to vector<8x128xf32>
    %380 = arith.mulf %379, %372 : vector<8x128xf32>
    %381 = arith.addf %354, %380 : vector<8x128xf32>
    %382 = vector.broadcast %44 : f32 to vector<8x128xf32>
    %383 = arith.mulf %382, %372 : vector<8x128xf32>
    %384 = arith.addf %357, %383 : vector<8x128xf32>
    %385 = vector.broadcast %56 : f32 to vector<8x128xf32>
    %386 = arith.mulf %385, %372 : vector<8x128xf32>
    %387 = arith.addf %360, %386 : vector<8x128xf32>
    %388 = vector.broadcast %68 : f32 to vector<8x128xf32>
    %389 = arith.mulf %388, %372 : vector<8x128xf32>
    %390 = arith.addf %363, %389 : vector<8x128xf32>
    %391 = vector.broadcast %80 : f32 to vector<8x128xf32>
    %392 = arith.mulf %391, %372 : vector<8x128xf32>
    %393 = arith.addf %366, %392 : vector<8x128xf32>
    %394 = vector.broadcast %92 : f32 to vector<8x128xf32>
    %395 = arith.mulf %394, %372 : vector<8x128xf32>
    %396 = arith.addf %369, %395 : vector<8x128xf32>
    %c9_309 = arith.constant 9 : index
    %397 = arith.index_cast %161 : i32 to index
    %c0_310 = arith.constant 0 : index
    %398 = vector.load %arg5[%c9_309, %397, %c0_310] : memref<12x8x128xf32, #tpu.memory_space<vmem>>, vector<1x8x128xf32>
    %399 = vector.shape_cast %398 : vector<1x8x128xf32> to vector<8x128xf32>
    %400 = vector.broadcast %9 : f32 to vector<8x128xf32>
    %401 = arith.mulf %400, %399 : vector<8x128xf32>
    %402 = arith.addf %375, %401 : vector<8x128xf32>
    %403 = vector.broadcast %21 : f32 to vector<8x128xf32>
    %404 = arith.mulf %403, %399 : vector<8x128xf32>
    %405 = arith.addf %378, %404 : vector<8x128xf32>
    %406 = vector.broadcast %33 : f32 to vector<8x128xf32>
    %407 = arith.mulf %406, %399 : vector<8x128xf32>
    %408 = arith.addf %381, %407 : vector<8x128xf32>
    %409 = vector.broadcast %45 : f32 to vector<8x128xf32>
    %410 = arith.mulf %409, %399 : vector<8x128xf32>
    %411 = arith.addf %384, %410 : vector<8x128xf32>
    %412 = vector.broadcast %57 : f32 to vector<8x128xf32>
    %413 = arith.mulf %412, %399 : vector<8x128xf32>
    %414 = arith.addf %387, %413 : vector<8x128xf32>
    %415 = vector.broadcast %69 : f32 to vector<8x128xf32>
    %416 = arith.mulf %415, %399 : vector<8x128xf32>
    %417 = arith.addf %390, %416 : vector<8x128xf32>
    %418 = vector.broadcast %81 : f32 to vector<8x128xf32>
    %419 = arith.mulf %418, %399 : vector<8x128xf32>
    %420 = arith.addf %393, %419 : vector<8x128xf32>
    %421 = vector.broadcast %93 : f32 to vector<8x128xf32>
    %422 = arith.mulf %421, %399 : vector<8x128xf32>
    %423 = arith.addf %396, %422 : vector<8x128xf32>
    %c10_311 = arith.constant 10 : index
    %424 = arith.index_cast %161 : i32 to index
    %c0_312 = arith.constant 0 : index
    %425 = vector.load %arg5[%c10_311, %424, %c0_312] : memref<12x8x128xf32, #tpu.memory_space<vmem>>, vector<1x8x128xf32>
    %426 = vector.shape_cast %425 : vector<1x8x128xf32> to vector<8x128xf32>
    %427 = vector.broadcast %10 : f32 to vector<8x128xf32>
    %428 = arith.mulf %427, %426 : vector<8x128xf32>
    %429 = arith.addf %402, %428 : vector<8x128xf32>
    %430 = vector.broadcast %22 : f32 to vector<8x128xf32>
    %431 = arith.mulf %430, %426 : vector<8x128xf32>
    %432 = arith.addf %405, %431 : vector<8x128xf32>
    %433 = vector.broadcast %34 : f32 to vector<8x128xf32>
    %434 = arith.mulf %433, %426 : vector<8x128xf32>
    %435 = arith.addf %408, %434 : vector<8x128xf32>
    %436 = vector.broadcast %46 : f32 to vector<8x128xf32>
    %437 = arith.mulf %436, %426 : vector<8x128xf32>
    %438 = arith.addf %411, %437 : vector<8x128xf32>
    %439 = vector.broadcast %58 : f32 to vector<8x128xf32>
    %440 = arith.mulf %439, %426 : vector<8x128xf32>
    %441 = arith.addf %414, %440 : vector<8x128xf32>
    %442 = vector.broadcast %70 : f32 to vector<8x128xf32>
    %443 = arith.mulf %442, %426 : vector<8x128xf32>
    %444 = arith.addf %417, %443 : vector<8x128xf32>
    %445 = vector.broadcast %82 : f32 to vector<8x128xf32>
    %446 = arith.mulf %445, %426 : vector<8x128xf32>
    %447 = arith.addf %420, %446 : vector<8x128xf32>
    %448 = vector.broadcast %94 : f32 to vector<8x128xf32>
    %449 = arith.mulf %448, %426 : vector<8x128xf32>
    %450 = arith.addf %423, %449 : vector<8x128xf32>
    %c11_313 = arith.constant 11 : index
    %451 = arith.index_cast %161 : i32 to index
    %c0_314 = arith.constant 0 : index
    %452 = vector.load %arg5[%c11_313, %451, %c0_314] : memref<12x8x128xf32, #tpu.memory_space<vmem>>, vector<1x8x128xf32>
    %453 = vector.shape_cast %452 : vector<1x8x128xf32> to vector<8x128xf32>
    %454 = vector.broadcast %11 : f32 to vector<8x128xf32>
    %455 = arith.mulf %454, %453 : vector<8x128xf32>
    %456 = arith.addf %429, %455 : vector<8x128xf32>
    %457 = vector.broadcast %23 : f32 to vector<8x128xf32>
    %458 = arith.mulf %457, %453 : vector<8x128xf32>
    %459 = arith.addf %432, %458 : vector<8x128xf32>
    %460 = vector.broadcast %35 : f32 to vector<8x128xf32>
    %461 = arith.mulf %460, %453 : vector<8x128xf32>
    %462 = arith.addf %435, %461 : vector<8x128xf32>
    %463 = vector.broadcast %47 : f32 to vector<8x128xf32>
    %464 = arith.mulf %463, %453 : vector<8x128xf32>
    %465 = arith.addf %438, %464 : vector<8x128xf32>
    %466 = vector.broadcast %59 : f32 to vector<8x128xf32>
    %467 = arith.mulf %466, %453 : vector<8x128xf32>
    %468 = arith.addf %441, %467 : vector<8x128xf32>
    %469 = vector.broadcast %71 : f32 to vector<8x128xf32>
    %470 = arith.mulf %469, %453 : vector<8x128xf32>
    %471 = arith.addf %444, %470 : vector<8x128xf32>
    %472 = vector.broadcast %83 : f32 to vector<8x128xf32>
    %473 = arith.mulf %472, %453 : vector<8x128xf32>
    %474 = arith.addf %447, %473 : vector<8x128xf32>
    %475 = vector.broadcast %95 : f32 to vector<8x128xf32>
    %476 = arith.mulf %475, %453 : vector<8x128xf32>
    %477 = arith.addf %450, %476 : vector<8x128xf32>
    %478 = vector.broadcast %96 : f32 to vector<8x128xf32>
    %479 = arith.addf %456, %478 : vector<8x128xf32>
    %cst = arith.constant 0.000000e+00 : f32
    %480 = vector.broadcast %cst : f32 to vector<8x128xf32>
    %481 = arith.maximumf %479, %480 : vector<8x128xf32>
    %482 = vector.broadcast %97 : f32 to vector<8x128xf32>
    %483 = arith.addf %459, %482 : vector<8x128xf32>
    %cst_315 = arith.constant 0.000000e+00 : f32
    %484 = vector.broadcast %cst_315 : f32 to vector<8x128xf32>
    %485 = arith.maximumf %483, %484 : vector<8x128xf32>
    %486 = vector.broadcast %98 : f32 to vector<8x128xf32>
    %487 = arith.addf %462, %486 : vector<8x128xf32>
    %cst_316 = arith.constant 0.000000e+00 : f32
    %488 = vector.broadcast %cst_316 : f32 to vector<8x128xf32>
    %489 = arith.maximumf %487, %488 : vector<8x128xf32>
    %490 = vector.broadcast %99 : f32 to vector<8x128xf32>
    %491 = arith.addf %465, %490 : vector<8x128xf32>
    %cst_317 = arith.constant 0.000000e+00 : f32
    %492 = vector.broadcast %cst_317 : f32 to vector<8x128xf32>
    %493 = arith.maximumf %491, %492 : vector<8x128xf32>
    %494 = vector.broadcast %100 : f32 to vector<8x128xf32>
    %495 = arith.addf %468, %494 : vector<8x128xf32>
    %cst_318 = arith.constant 0.000000e+00 : f32
    %496 = vector.broadcast %cst_318 : f32 to vector<8x128xf32>
    %497 = arith.maximumf %495, %496 : vector<8x128xf32>
    %498 = vector.broadcast %101 : f32 to vector<8x128xf32>
    %499 = arith.addf %471, %498 : vector<8x128xf32>
    %cst_319 = arith.constant 0.000000e+00 : f32
    %500 = vector.broadcast %cst_319 : f32 to vector<8x128xf32>
    %501 = arith.maximumf %499, %500 : vector<8x128xf32>
    %502 = vector.broadcast %102 : f32 to vector<8x128xf32>
    %503 = arith.addf %474, %502 : vector<8x128xf32>
    %cst_320 = arith.constant 0.000000e+00 : f32
    %504 = vector.broadcast %cst_320 : f32 to vector<8x128xf32>
    %505 = arith.maximumf %503, %504 : vector<8x128xf32>
    %506 = vector.broadcast %103 : f32 to vector<8x128xf32>
    %507 = arith.addf %477, %506 : vector<8x128xf32>
    %cst_321 = arith.constant 0.000000e+00 : f32
    %508 = vector.broadcast %cst_321 : f32 to vector<8x128xf32>
    %509 = arith.maximumf %507, %508 : vector<8x128xf32>
    %510 = vector.broadcast %104 : f32 to vector<8x128xf32>
    %511 = arith.mulf %510, %481 : vector<8x128xf32>
    %512 = vector.broadcast %105 : f32 to vector<8x128xf32>
    %513 = arith.mulf %512, %485 : vector<8x128xf32>
    %514 = arith.addf %511, %513 : vector<8x128xf32>
    %515 = vector.broadcast %106 : f32 to vector<8x128xf32>
    %516 = arith.mulf %515, %489 : vector<8x128xf32>
    %517 = arith.addf %514, %516 : vector<8x128xf32>
    %518 = vector.broadcast %107 : f32 to vector<8x128xf32>
    %519 = arith.mulf %518, %493 : vector<8x128xf32>
    %520 = arith.addf %517, %519 : vector<8x128xf32>
    %521 = vector.broadcast %108 : f32 to vector<8x128xf32>
    %522 = arith.mulf %521, %497 : vector<8x128xf32>
    %523 = arith.addf %520, %522 : vector<8x128xf32>
    %524 = vector.broadcast %109 : f32 to vector<8x128xf32>
    %525 = arith.mulf %524, %501 : vector<8x128xf32>
    %526 = arith.addf %523, %525 : vector<8x128xf32>
    %527 = vector.broadcast %110 : f32 to vector<8x128xf32>
    %528 = arith.mulf %527, %505 : vector<8x128xf32>
    %529 = arith.addf %526, %528 : vector<8x128xf32>
    %530 = vector.broadcast %111 : f32 to vector<8x128xf32>
    %531 = arith.mulf %530, %509 : vector<8x128xf32>
    %532 = arith.addf %529, %531 : vector<8x128xf32>
    %533 = vector.broadcast %152 : f32 to vector<8x128xf32>
    %534 = arith.addf %532, %533 : vector<8x128xf32>
    %cst_322 = arith.constant 0.000000e+00 : f32
    %535 = vector.broadcast %cst_322 : f32 to vector<8x128xf32>
    %536 = arith.maximumf %534, %535 : vector<8x128xf32>
    %c0_323 = arith.constant 0 : index
    %537 = arith.index_cast %161 : i32 to index
    %c0_324 = arith.constant 0 : index
    %538 = vector.load %arg6[%c0_323, %537, %c0_324] : memref<6x8x128xf32, #tpu.memory_space<vmem>>, vector<1x8x128xf32>
    %539 = vector.shape_cast %538 : vector<1x8x128xf32> to vector<8x128xf32>
    %540 = vector.shape_cast %536 : vector<8x128xf32> to vector<1x8x128xf32>
    tpu.vector_store %arg6[%c0_323, %537, %c0_324], %540 {strides = array<i32>} : memref<6x8x128xf32, #tpu.memory_space<vmem>>, vector<1x8x128xf32>,
    %541 = vector.broadcast %112 : f32 to vector<8x128xf32>
    %542 = arith.mulf %541, %481 : vector<8x128xf32>
    %543 = vector.broadcast %113 : f32 to vector<8x128xf32>
    %544 = arith.mulf %543, %485 : vector<8x128xf32>
    %545 = arith.addf %542, %544 : vector<8x128xf32>
    %546 = vector.broadcast %114 : f32 to vector<8x128xf32>
    %547 = arith.mulf %546, %489 : vector<8x128xf32>
    %548 = arith.addf %545, %547 : vector<8x128xf32>
    %549 = vector.broadcast %115 : f32 to vector<8x128xf32>
    %550 = arith.mulf %549, %493 : vector<8x128xf32>
    %551 = arith.addf %548, %550 : vector<8x128xf32>
    %552 = vector.broadcast %116 : f32 to vector<8x128xf32>
    %553 = arith.mulf %552, %497 : vector<8x128xf32>
    %554 = arith.addf %551, %553 : vector<8x128xf32>
    %555 = vector.broadcast %117 : f32 to vector<8x128xf32>
    %556 = arith.mulf %555, %501 : vector<8x128xf32>
    %557 = arith.addf %554, %556 : vector<8x128xf32>
    %558 = vector.broadcast %118 : f32 to vector<8x128xf32>
    %559 = arith.mulf %558, %505 : vector<8x128xf32>
    %560 = arith.addf %557, %559 : vector<8x128xf32>
    %561 = vector.broadcast %119 : f32 to vector<8x128xf32>
    %562 = arith.mulf %561, %509 : vector<8x128xf32>
    %563 = arith.addf %560, %562 : vector<8x128xf32>
    %564 = vector.broadcast %153 : f32 to vector<8x128xf32>
    %565 = arith.addf %563, %564 : vector<8x128xf32>
    %cst_325 = arith.constant 0.000000e+00 : f32
    %566 = vector.broadcast %cst_325 : f32 to vector<8x128xf32>
    %567 = arith.maximumf %565, %566 : vector<8x128xf32>
    %c1_326 = arith.constant 1 : index
    %568 = arith.index_cast %161 : i32 to index
    %c0_327 = arith.constant 0 : index
    %569 = vector.load %arg6[%c1_326, %568, %c0_327] : memref<6x8x128xf32, #tpu.memory_space<vmem>>, vector<1x8x128xf32>
    %570 = vector.shape_cast %569 : vector<1x8x128xf32> to vector<8x128xf32>
    %571 = vector.shape_cast %567 : vector<8x128xf32> to vector<1x8x128xf32>
    tpu.vector_store %arg6[%c1_326, %568, %c0_327], %571 {strides = array<i32>} : memref<6x8x128xf32, #tpu.memory_space<vmem>>, vector<1x8x128xf32>,
    %572 = vector.broadcast %120 : f32 to vector<8x128xf32>
    %573 = arith.mulf %572, %481 : vector<8x128xf32>
    %574 = vector.broadcast %121 : f32 to vector<8x128xf32>
    %575 = arith.mulf %574, %485 : vector<8x128xf32>
    %576 = arith.addf %573, %575 : vector<8x128xf32>
    %577 = vector.broadcast %122 : f32 to vector<8x128xf32>
    %578 = arith.mulf %577, %489 : vector<8x128xf32>
    %579 = arith.addf %576, %578 : vector<8x128xf32>
    %580 = vector.broadcast %123 : f32 to vector<8x128xf32>
    %581 = arith.mulf %580, %493 : vector<8x128xf32>
    %582 = arith.addf %579, %581 : vector<8x128xf32>
    %583 = vector.broadcast %124 : f32 to vector<8x128xf32>
    %584 = arith.mulf %583, %497 : vector<8x128xf32>
    %585 = arith.addf %582, %584 : vector<8x128xf32>
    %586 = vector.broadcast %125 : f32 to vector<8x128xf32>
    %587 = arith.mulf %586, %501 : vector<8x128xf32>
    %588 = arith.addf %585, %587 : vector<8x128xf32>
    %589 = vector.broadcast %126 : f32 to vector<8x128xf32>
    %590 = arith.mulf %589, %505 : vector<8x128xf32>
    %591 = arith.addf %588, %590 : vector<8x128xf32>
    %592 = vector.broadcast %127 : f32 to vector<8x128xf32>
    %593 = arith.mulf %592, %509 : vector<8x128xf32>
    %594 = arith.addf %591, %593 : vector<8x128xf32>
    %595 = vector.broadcast %154 : f32 to vector<8x128xf32>
    %596 = arith.addf %594, %595 : vector<8x128xf32>
    %cst_328 = arith.constant 0.000000e+00 : f32
    %597 = vector.broadcast %cst_328 : f32 to vector<8x128xf32>
    %598 = arith.maximumf %596, %597 : vector<8x128xf32>
    %c2_329 = arith.constant 2 : index
    %599 = arith.index_cast %161 : i32 to index
    %c0_330 = arith.constant 0 : index
    %600 = vector.load %arg6[%c2_329, %599, %c0_330] : memref<6x8x128xf32, #tpu.memory_space<vmem>>, vector<1x8x128xf32>
    %601 = vector.shape_cast %600 : vector<1x8x128xf32> to vector<8x128xf32>
    %602 = vector.shape_cast %598 : vector<8x128xf32> to vector<1x8x128xf32>
    tpu.vector_store %arg6[%c2_329, %599, %c0_330], %602 {strides = array<i32>} : memref<6x8x128xf32, #tpu.memory_space<vmem>>, vector<1x8x128xf32>,
    %603 = vector.broadcast %128 : f32 to vector<8x128xf32>
    %604 = arith.mulf %603, %481 : vector<8x128xf32>
    %605 = vector.broadcast %129 : f32 to vector<8x128xf32>
    %606 = arith.mulf %605, %485 : vector<8x128xf32>
    %607 = arith.addf %604, %606 : vector<8x128xf32>
    %608 = vector.broadcast %130 : f32 to vector<8x128xf32>
    %609 = arith.mulf %608, %489 : vector<8x128xf32>
    %610 = arith.addf %607, %609 : vector<8x128xf32>
    %611 = vector.broadcast %131 : f32 to vector<8x128xf32>
    %612 = arith.mulf %611, %493 : vector<8x128xf32>
    %613 = arith.addf %610, %612 : vector<8x128xf32>
    %614 = vector.broadcast %132 : f32 to vector<8x128xf32>
    %615 = arith.mulf %614, %497 : vector<8x128xf32>
    %616 = arith.addf %613, %615 : vector<8x128xf32>
    %617 = vector.broadcast %133 : f32 to vector<8x128xf32>
    %618 = arith.mulf %617, %501 : vector<8x128xf32>
    %619 = arith.addf %616, %618 : vector<8x128xf32>
    %620 = vector.broadcast %134 : f32 to vector<8x128xf32>
    %621 = arith.mulf %620, %505 : vector<8x128xf32>
    %622 = arith.addf %619, %621 : vector<8x128xf32>
    %623 = vector.broadcast %135 : f32 to vector<8x128xf32>
    %624 = arith.mulf %623, %509 : vector<8x128xf32>
    %625 = arith.addf %622, %624 : vector<8x128xf32>
    %626 = vector.broadcast %155 : f32 to vector<8x128xf32>
    %627 = arith.addf %625, %626 : vector<8x128xf32>
    %cst_331 = arith.constant 0.000000e+00 : f32
    %628 = vector.broadcast %cst_331 : f32 to vector<8x128xf32>
    %629 = arith.maximumf %627, %628 : vector<8x128xf32>
    %c3_332 = arith.constant 3 : index
    %630 = arith.index_cast %161 : i32 to index
    %c0_333 = arith.constant 0 : index
    %631 = vector.load %arg6[%c3_332, %630, %c0_333] : memref<6x8x128xf32, #tpu.memory_space<vmem>>, vector<1x8x128xf32>
    %632 = vector.shape_cast %631 : vector<1x8x128xf32> to vector<8x128xf32>
    %633 = vector.shape_cast %629 : vector<8x128xf32> to vector<1x8x128xf32>
    tpu.vector_store %arg6[%c3_332, %630, %c0_333], %633 {strides = array<i32>} : memref<6x8x128xf32, #tpu.memory_space<vmem>>, vector<1x8x128xf32>,
    %634 = vector.broadcast %136 : f32 to vector<8x128xf32>
    %635 = arith.mulf %634, %481 : vector<8x128xf32>
    %636 = vector.broadcast %137 : f32 to vector<8x128xf32>
    %637 = arith.mulf %636, %485 : vector<8x128xf32>
    %638 = arith.addf %635, %637 : vector<8x128xf32>
    %639 = vector.broadcast %138 : f32 to vector<8x128xf32>
    %640 = arith.mulf %639, %489 : vector<8x128xf32>
    %641 = arith.addf %638, %640 : vector<8x128xf32>
    %642 = vector.broadcast %139 : f32 to vector<8x128xf32>
    %643 = arith.mulf %642, %493 : vector<8x128xf32>
    %644 = arith.addf %641, %643 : vector<8x128xf32>
    %645 = vector.broadcast %140 : f32 to vector<8x128xf32>
    %646 = arith.mulf %645, %497 : vector<8x128xf32>
    %647 = arith.addf %644, %646 : vector<8x128xf32>
    %648 = vector.broadcast %141 : f32 to vector<8x128xf32>
    %649 = arith.mulf %648, %501 : vector<8x128xf32>
    %650 = arith.addf %647, %649 : vector<8x128xf32>
    %651 = vector.broadcast %142 : f32 to vector<8x128xf32>
    %652 = arith.mulf %651, %505 : vector<8x128xf32>
    %653 = arith.addf %650, %652 : vector<8x128xf32>
    %654 = vector.broadcast %143 : f32 to vector<8x128xf32>
    %655 = arith.mulf %654, %509 : vector<8x128xf32>
    %656 = arith.addf %653, %655 : vector<8x128xf32>
    %657 = vector.broadcast %156 : f32 to vector<8x128xf32>
    %658 = arith.addf %656, %657 : vector<8x128xf32>
    %cst_334 = arith.constant 0.000000e+00 : f32
    %659 = vector.broadcast %cst_334 : f32 to vector<8x128xf32>
    %660 = arith.maximumf %658, %659 : vector<8x128xf32>
    %c4_335 = arith.constant 4 : index
    %661 = arith.index_cast %161 : i32 to index
    %c0_336 = arith.constant 0 : index
    %662 = vector.load %arg6[%c4_335, %661, %c0_336] : memref<6x8x128xf32, #tpu.memory_space<vmem>>, vector<1x8x128xf32>
    %663 = vector.shape_cast %662 : vector<1x8x128xf32> to vector<8x128xf32>
    %664 = vector.shape_cast %660 : vector<8x128xf32> to vector<1x8x128xf32>
    tpu.vector_store %arg6[%c4_335, %661, %c0_336], %664 {strides = array<i32>} : memref<6x8x128xf32, #tpu.memory_space<vmem>>, vector<1x8x128xf32>,
    %665 = vector.broadcast %144 : f32 to vector<8x128xf32>
    %666 = arith.mulf %665, %481 : vector<8x128xf32>
    %667 = vector.broadcast %145 : f32 to vector<8x128xf32>
    %668 = arith.mulf %667, %485 : vector<8x128xf32>
    %669 = arith.addf %666, %668 : vector<8x128xf32>
    %670 = vector.broadcast %146 : f32 to vector<8x128xf32>
    %671 = arith.mulf %670, %489 : vector<8x128xf32>
    %672 = arith.addf %669, %671 : vector<8x128xf32>
    %673 = vector.broadcast %147 : f32 to vector<8x128xf32>
    %674 = arith.mulf %673, %493 : vector<8x128xf32>
    %675 = arith.addf %672, %674 : vector<8x128xf32>
    %676 = vector.broadcast %148 : f32 to vector<8x128xf32>
    %677 = arith.mulf %676, %497 : vector<8x128xf32>
    %678 = arith.addf %675, %677 : vector<8x128xf32>
    %679 = vector.broadcast %149 : f32 to vector<8x128xf32>
    %680 = arith.mulf %679, %501 : vector<8x128xf32>
    %681 = arith.addf %678, %680 : vector<8x128xf32>
    %682 = vector.broadcast %150 : f32 to vector<8x128xf32>
    %683 = arith.mulf %682, %505 : vector<8x128xf32>
    %684 = arith.addf %681, %683 : vector<8x128xf32>
    %685 = vector.broadcast %151 : f32 to vector<8x128xf32>
    %686 = arith.mulf %685, %509 : vector<8x128xf32>
    %687 = arith.addf %684, %686 : vector<8x128xf32>
    %688 = vector.broadcast %157 : f32 to vector<8x128xf32>
    %689 = arith.addf %687, %688 : vector<8x128xf32>
    %cst_337 = arith.constant 0.000000e+00 : f32
    %690 = vector.broadcast %cst_337 : f32 to vector<8x128xf32>
    %691 = arith.maximumf %689, %690 : vector<8x128xf32>
    %c5_338 = arith.constant 5 : index
    %692 = arith.index_cast %161 : i32 to index
    %c0_339 = arith.constant 0 : index
    %693 = vector.load %arg6[%c5_338, %692, %c0_339] : memref<6x8x128xf32, #tpu.memory_space<vmem>>, vector<1x8x128xf32>
    %694 = vector.shape_cast %693 : vector<1x8x128xf32> to vector<8x128xf32>
    %695 = vector.shape_cast %691 : vector<8x128xf32> to vector<1x8x128xf32>
    tpu.vector_store %arg6[%c5_338, %692, %c0_339], %695 {strides = array<i32>} : memref<6x8x128xf32, #tpu.memory_space<vmem>>, vector<1x8x128xf32>,
    %c1_i32_340 = arith.constant 1 : i32
    return
  }
  func.func @transform_0(%arg0: i32) -> (i32, i32) {
    %c0_i32 = arith.constant 0 : i32
    %c0_i32_0 = arith.constant 0 : i32
    %c0_i32_1 = arith.constant 0 : i32
    return %c0_i32, %c0_i32_0 : i32, i32
  }
  func.func @transform_1(%arg0: i32) -> i32 {
    %c0_i32 = arith.constant 0 : i32
    %c0_i32_0 = arith.constant 0 : i32
    return %c0_i32 : i32
  }
  func.func @transform_2(%arg0: i32) -> (i32, i32) {
    %c0_i32 = arith.constant 0 : i32
    %c0_i32_0 = arith.constant 0 : i32
    %c0_i32_1 = arith.constant 0 : i32
    return %c0_i32, %c0_i32_0 : i32, i32
  }
  func.func @transform_3(%arg0: i32) -> i32 {
    %c0_i32 = arith.constant 0 : i32
    %c0_i32_0 = arith.constant 0 : i32
    return %c0_i32 : i32
  }
  func.func @transform_4(%arg0: i32) -> (i32, i32, i32) {
    %c0_i32 = arith.constant 0 : i32
    %c0_i32_0 = arith.constant 0 : i32
    %c0_i32_1 = arith.constant 0 : i32
    return %c0_i32, %arg0, %c0_i32_0 : i32, i32, i32
  }
  func.func @transform_5(%arg0: i32) -> (i32, i32, i32) {
    %c0_i32 = arith.constant 0 : i32
    %c0_i32_0 = arith.constant 0 : i32
    %c0_i32_1 = arith.constant 0 : i32
    return %c0_i32, %arg0, %c0_i32_0 : i32, i32, i32
  }
}

</mosaic_0001>

<bundles_post_ra>
// kernel: scaled_xornet_forward.1
= control target key start
LH: loop header
LB: loop body
LE: loop exit
PB: predicated region body
PF: predicated region fallthrough
CT: control target
= control target key end

     0   :  { %s1749_s0 = inlined_call_operand.vmem [shape: f32[8,12], index: 0, kind: input, shape index: {}]   ;;  %s1750_s1 = inlined_call_operand.vmem [shape: f32[8], index: 1, kind: input, shape index: {}]   ;;  %s1751_s2 = inlined_call_operand.vmem [shape: f32[6,8], index: 2, kind: input, shape index: {}]   ;;  %s1752_s3 = inlined_call_operand.vmem [shape: f32[6], index: 3, kind: input, shape index: {}]   ;;  %s1753_s4 = inlined_call_operand.vmem [shape: f32[12,8,128], index: 4, kind: input, shape index: {}]   ;;  %s1754_s5 = inlined_call_operand.vmem [shape: f32[6,8,128], index: 5, kind: output, shape index: {}]  }
   0x1   :  { %1756 = sst [smem:[#allocation28_spill]] %s1754_s5 }
   0x2   :  { %10 = vsyncpa [#allocation3], 0 }
   0x3   :  { %11 = vsyncpa [#allocation5], 0  ;;  %s29_s20 = sshll.u32 %s1750_s1, 4  ;;  %s30_s20 = int_to_ptr.vmem [resolvable:$true] %s29_s20 }
   0x4   :  { %12 = vsyncpa [#allocation8], 0  ;;  %s19_s23 = sshll.u32 %s1749_s0, 4  ;;  %s928_s24 = scalar_lea.vmem %s30_s20, 16  ;;  %s20_s23 = int_to_ptr.vmem [resolvable:$true] %s19_s23 }
   0x5   :  { %p929_p0 = scmp.ne.s32.totalorder %s30_s20, %s928_s24  ;;  %p933_p1 = scmp.lt.s32.totalorder %s30_s20, %s30_s20 }
   0x6   :  { %p934_p2 = scmp.lt.s32.totalorder %s928_s24, %s928_s24 }
   0x8   :  { %p935_p3 = por %p934_p2, %p933_p1 }
   0xa   :  { %p936_p4 = pnand %p935_p3, %p929_p0 }
   0xc   :  { %939 = shalt.err (!%p936_p4)
}
   0xd   :  { %s982_s25 = smov [#allocation4]   ;;  %s940_s26 = scalar_lea.vmem %s20_s23, 128 }
   0xe   :  { %32 = dma.vmem_to_smem %s30_s20, 16, %s982_s25, [#allocation5]  }
   0xf   :  { %p941_p5 = scmp.ne.s32.totalorder %s20_s23, %s940_s26  ;;  %p945_p6 = scmp.lt.s32.totalorder %s20_s23, %s20_s23 }
  0x10   :  { %p946_p7 = scmp.lt.s32.totalorder %s940_s26, %s940_s26 }
  0x12   :  { %p947_p8 = por %p946_p7, %p945_p6 }
  0x14   :  { %p948_p9 = pnand %p947_p8, %p941_p5 }
  0x16   :  { %951 = shalt.err (!%p948_p9)
}
  0x17   :  { %s983_s1 = smov [#allocation2]   ;;  %s39_s28 = sshll.u32 %s1751_s2, 4  ;;  %s40_s28 = int_to_ptr.vmem [resolvable:$true] %s39_s28 }
  0x18   :  { %22 = dma.vmem_to_smem %s20_s23, 128, %s983_s1, [#allocation3]  }
  0x19   :  { %s49_s6 = sshll.u32 %s1752_s3, 4  ;;  %s952_s7 = scalar_lea.vmem %s40_s28, 128  ;;  %s50_s6 = int_to_ptr.vmem [resolvable:$true] %s49_s6 }
  0x1a   :  { %p953_p10 = scmp.ne.s32.totalorder %s40_s28, %s952_s7  ;;  %p957_p11 = scmp.lt.s32.totalorder %s40_s28, %s40_s28 }
  0x1b   :  { %p958_p12 = scmp.lt.s32.totalorder %s952_s7, %s952_s7 }
  0x1d   :  { %p959_p13 = por %p958_p12, %p957_p11 }
  0x1f   :  { %p960_p0 = pnand %p959_p13, %p953_p10 }
  0x21   :  { %963 = shalt.err (!%p960_p0)
}
  0x22   :  { %s984_s8 = smov [#allocation6]   ;;  %s964_s9 = scalar_lea.vmem %s50_s6, 16 }
  0x23   :  { %42 = dma.vmem_to_smem %s40_s28, 128, %s984_s8, [#allocation5]  }
  0x24   :  { %p965_p1 = scmp.ne.s32.totalorder %s50_s6, %s964_s9  ;;  %p969_p2 = scmp.lt.s32.totalorder %s50_s6, %s50_s6 }
  0x25   :  { %p970_p3 = scmp.lt.s32.totalorder %s964_s9, %s964_s9 }
  0x27   :  { %p971_p4 = por %p970_p3, %p969_p2 }
  0x29   :  { %p972_p5 = pnand %p971_p4, %p965_p1 }
  0x2b   :  { %975 = shalt.err (!%p972_p5)
}
  0x2c   :  { %s985_s2 = smov [#allocation7]  }
  0x2d   :  { %52 = dma.vmem_to_smem %s50_s6, 16, %s985_s2, [#allocation8]  }
  0x2e   :  { %976 = dma.done.wait [#allocation3], 128  }
  0x2f   :  { %977 = vsyncadd [#allocation3], 4294967168 }
  0x30   :  { %978 = dma.done.wait [#allocation5], 144  }
  0x31   :  { %979 = vsyncadd [#allocation5], 4294967152 }
  0x32   :  { %980 = dma.done.wait [#allocation8], 16  }
  0x33   :  { %981 = vsyncadd [#allocation8], 4294967280 }
  0x34   :  { %67 = sfence }
  0x35   :  { %s68_s3 = sld [smem:[#allocation2]]  ;;  %v1069_v0 = vld [vmem:[%s1753_s4] sm:$0xff]  ;;  %v1074_v2 = vld [vmem:[%s1753_s4 + $0x8] sm:$0xff]  ;;  %v1089_v6 = vld [vmem:[%s1753_s4 + $0x10] sm:$0xff] }
  0x36   :  { %s754_s10 = sld [smem:[#allocation2 + $0x1]]  ;;  %v1104_v10 = vld [vmem:[%s1753_s4 + $0x18] sm:$0xff]  ;;  %v1119_v14 = vld [vmem:[%s1753_s4 + $0x20] sm:$0xff]  ;;  %v1138_v22 = vld [vmem:[%s1753_s4 + $0x28] sm:$0xff] }
  0x37   :  { %s1028_s11 = sld [smem:[#allocation2 + $0x2]]  ;;  %v1155_v29 = vld [vmem:[%s1753_s4 + $0x30] sm:$0xff]  ;;  %v1172_v36 = vld [vmem:[%s1753_s4 + $0x38] sm:$0xff]  ;;  %v1189_v43 = vld [vmem:[%s1753_s4 + $0x40] sm:$0xff] }
  0x38   :  { %s1030_s12 = sld [smem:[#allocation2 + $0x3]]  ;;  %v1207_v51 = vld [vmem:[%s1753_s4 + $0x48] sm:$0xff]  ;;  %v1229_v63 = vld [vmem:[%s1753_s4 + $0x50] sm:$0xff] }
  0x39   :  { %s1032_s13 = sld [smem:[#allocation2 + $0x4]] }
  0x3a   :  { %s1034_s14 = sld [smem:[#allocation2 + $0x5]] }
  0x3b   :  { %s1036_s15 = sld [smem:[#allocation2 + $0x6]]  ;;  %v227_v1 = vstv %s68_s3 }
  0x3c   :  { %s1038_s16 = sld [smem:[#allocation2 + $0x7]]  ;;  %v246_v3 = vstv %s754_s10  ;;  %v228_v4 = vmul.f32 %v227_v1, %v1069_v0 }
  0x3d   :  { %s1040_s17 = sld [smem:[#allocation2 + $0x8]]  ;;  %v247_v5 = vmul.f32 %v1074_v2, %v246_v3  ;;  %v273_v7 = vstv %s1028_s11 }
  0x3e   :  { %s1042_s18 = sld [smem:[#allocation2 + $0x9]]  ;;  %v274_v9 = vmul.f32 %v1089_v6, %v273_v7  ;;  %v300_v11 = vstv %s1030_s12 }
  0x3f   :  { %s1044_s19 = sld [smem:[#allocation2 + $0xa]]  ;;  %v248_v8 = vadd.f32 %v247_v5, %v228_v4  ;;  %v301_v13 = vmul.f32 %v1104_v10, %v300_v11  ;;  %v327_v15 = vstv %s1032_s13 }
  0x40   :  { %s1046_s20 = sld [smem:[#allocation2 + $0xb]]  ;;  %v328_v19 = vmul.f32 %v1119_v14, %v327_v15  ;;  %v354_v23 = vstv %s1034_s14 }
  0x41   :  { %s1048_s21 = sld [smem:[#allocation2 + $0x80]]  ;;  %v275_v12 = vadd.f32 %v274_v9, %v248_v8  ;;  %v355_v26 = vmul.f32 %v1138_v22, %v354_v23  ;;  %v381_v30 = vstv %s1036_s15 }
  0x42   :  { %s1050_s22 = sld [smem:[#allocation2 + $0x81]]  ;;  %v382_v33 = vmul.f32 %v1155_v29, %v381_v30  ;;  %v408_v37 = vstv %s1038_s16 }
  0x43   :  { %s1052_s23 = sld [smem:[#allocation2 + $0x82]]  ;;  %v302_v18 = vadd.f32 %v301_v13, %v275_v12  ;;  %v409_v40 = vmul.f32 %v1172_v36, %v408_v37  ;;  %v435_v44 = vstv %s1040_s17  ;;  %v1248_v13 = vld [vmem:[%s1753_s4 + $0x58] sm:$0xff] }
  0x44   :  { %s1054_s24 = sld [smem:[#allocation2 + $0x83]]  ;;  %v436_v47 = vmul.f32 %v1189_v43, %v435_v44  ;;  %v462_v52 = vstv %s1042_s18 }
  0x45   :  { %s1056_s25 = sld [smem:[#allocation2 + $0x84]]  ;;  %v329_v25 = vadd.f32 %v328_v19, %v302_v18  ;;  %v463_v57 = vmul.f32 %v1207_v51, %v462_v52  ;;  %v489_v58 = vstv %s1044_s19 }
  0x46   :  { %s1058_s26 = sld [smem:[#allocation2 + $0x85]]  ;;  %v490_v5 = vmul.f32 %v1229_v63, %v489_v58  ;;  %v516_v7 = vstv %s1046_s20 }
  0x47   :  { %s1060_s1 = sld [smem:[#allocation2 + $0x86]]  ;;  %v229_v16 = vstv %s1048_s21  ;;  %v356_v32 = vadd.f32 %v355_v26, %v329_v25 }
  0x48   :  { %s1062_s0 = sld [smem:[#allocation2 + $0x87]]  ;;  %v249_v17 = vstv %s1050_s22  ;;  %v230_v20 = vmul.f32 %v229_v16, %v1069_v0 }
  0x49   :  { %s1064_s27 = sld [smem:[#allocation2 + $0x88]]  ;;  %v250_v21 = vmul.f32 %v1074_v2, %v249_v17  ;;  %v276_v24 = vstv %s1052_s23  ;;  %v383_v39 = vadd.f32 %v382_v33, %v356_v32 }
  0x4a   :  { %s1076_s7 = sld [smem:[#allocation2 + $0x89]]  ;;  %v277_v28 = vmul.f32 %v1089_v6, %v276_v24  ;;  %v303_v31 = vstv %s1054_s24 }
  0x4b   :  { %s1078_s8 = sld [smem:[#allocation2 + $0x8a]]  ;;  %v251_v27 = vadd.f32 %v250_v21, %v230_v20  ;;  %v304_v35 = vmul.f32 %v1104_v10, %v303_v31  ;;  %v330_v38 = vstv %s1056_s25  ;;  %v410_v46 = vadd.f32 %v409_v40, %v383_v39 }
  0x4c   :  { %s1080_s9 = sld [smem:[#allocation2 + $0x8b]]  ;;  %v331_v42 = vmul.f32 %v1119_v14, %v330_v38  ;;  %v357_v45 = vstv %s1058_s26  ;;  %v517_v21 = vmul.f32 %v1248_v13, %v516_v7 }
  0x4d   :  { %s1084_s2 = sld [smem:[#allocation2 + $0x100]]  ;;  %v278_v34 = vadd.f32 %v277_v28, %v251_v27  ;;  %v358_v49 = vmul.f32 %v1138_v22, %v357_v45  ;;  %v384_v50 = vstv %s1060_s1  ;;  %v437_v56 = vadd.f32 %v436_v47, %v410_v46 }
  0x4e   :  { %s1092_s10 = sld [smem:[#allocation2 + $0x101]]  ;;  %v385_v55 = vmul.f32 %v1155_v29, %v384_v50  ;;  %v411_v62 = vstv %s1062_s0 }
  0x4f   :  { %s1094_s29 = sld [smem:[#allocation2 + $0x102]]  ;;  %v305_v41 = vadd.f32 %v304_v35, %v278_v34  ;;  %v412_v3 = vmul.f32 %v1172_v36, %v411_v62  ;;  %v464_v4 = vadd.f32 %v463_v57, %v437_v56  ;;  %v438_v12 = vstv %s1064_s27 }
  0x50   :  { %1757 = sst [smem:[#allocation12_spill]] %s1076_s7  ;;  %v439_v18 = vmul.f32 %v1189_v43, %v438_v12 }
  0x51   :  { %1758 = sst [smem:[#allocation13_spill]] %s1078_s8  ;;  %v332_v48 = vadd.f32 %v331_v42, %v305_v41  ;;  %v491_v20 = vadd.f32 %v490_v5, %v464_v4 }
  0x52   :  { %1759 = sst [smem:[#allocation14_spill]] %s1080_s9 }
  0x53   :  { %s1096_s30 = sld [smem:[#allocation2 + $0x103]]  ;;  %v231_v53 = vstv %s1084_s2  ;;  %v359_v61 = vadd.f32 %v358_v49, %v332_v48  ;;  %v1281_v38 = vadd.f32 %v517_v21, %v491_v20 }
  0x54   :  { %s1099_s6 = sld [smem:[#allocation2 + $0x104]]  ;;  %v252_v54 = vstv %s1092_s10  ;;  %v232_v59 = vmul.f32 %v231_v53, %v1069_v0 }
  0x55   :  { %s1107_s11 = sld [smem:[#allocation2 + $0x105]]  ;;  %v253_v60 = vmul.f32 %v1074_v2, %v252_v54  ;;  %v279_v1 = vstv %s1094_s29  ;;  %v386_v11 = vadd.f32 %v385_v55, %v359_v61 }
  0x56   :  { %s1109_s3 = sld [smem:[#allocation2 + $0x106]]  ;;  %v280_v9 = vmul.f32 %v1089_v6, %v279_v1 }
  0x57   :  { %s1111_s28 = sld [smem:[#allocation2 + $0x107]]  ;;  %v254_v8 = vadd.f32 %v253_v60, %v232_v59  ;;  %v413_v25 = vadd.f32 %v412_v3, %v386_v11 }
  0x58   :  { %s1114_s8 = sld [smem:[#allocation2 + $0x108]] }
  0x59   :  { %s1122_s5 = sld [smem:[#allocation2 + $0x109]]  ;;  %v306_v15 = vstv %s1096_s30  ;;  %v281_v23 = vadd.f32 %v280_v9, %v254_v8  ;;  %v440_v44 = vadd.f32 %v439_v18, %v413_v25 }
  0x5a   :  { %1760 = sst [smem:[#allocation15_spill]] %s1099_s6  ;;  %v307_v24 = vmul.f32 %v1104_v10, %v306_v15 }
  0x5b   :  { %s1126_s12 = sld [smem:[#allocation2 + $0x10a]]  ;;  %v360_v35 = vstv %s1107_s11 }
  0x5c   :  { %s1128_s9 = sld [smem:[#allocation2 + $0x10b]]  ;;  %v308_v41 = vadd.f32 %v307_v24, %v281_v23  ;;  %v361_v50 = vmul.f32 %v1138_v22, %v360_v35  ;;  %v387_v52 = vstv %s1109_s3 }
  0x5d   :  { %s1141_s21 = sld [smem:[#allocation2 + $0x181]]  ;;  %v414_v56 = vstv %s1111_s28  ;;  %v388_v9 = vmul.f32 %v1155_v29, %v387_v52 }
  0x5e   :  { %1761 = sst [smem:[#allocation16_spill]] %s1114_s8  ;;  %v415_v12 = vmul.f32 %v1172_v36, %v414_v56 }
  0x5f   :  { %s1131_s8 = sld [smem:[#allocation2 + $0x180]]  ;;  %v468_v61 = vstv %s1122_s5 }
  0x60   :  { %s1144_s22 = sld [smem:[#allocation2 + $0x182]] }
  0x61   :  { %1762 = sst [smem:[#allocation17_spill]] %s1126_s12 }
  0x62   :  { %1763 = sst [smem:[#allocation18_spill]] %s1128_s9 }
  0x63   :  { %s1146_s6 = sld [smem:[#allocation2 + $0x183]]  ;;  %v255_v17 = vstv %s1141_s21 }
  0x64   :  { %s1149_s9 = sld [smem:[#allocation2 + $0x184]]  ;;  %v256_v28 = vmul.f32 %v1074_v2, %v255_v17 }
  0x65   :  { %s1158_s14 = sld [smem:[#allocation2 + $0x185]]  ;;  %v233_v16 = vstv %s1131_s8 }
  0x66   :  { %s1161_s23 = sld [smem:[#allocation2 + $0x186]]  ;;  %v234_v27 = vmul.f32 %v233_v16, %v1069_v0  ;;  %v282_v30 = vstv %s1144_s22  ;;  %v1329_v16 = vmul.f32 %v1207_v51, %v468_v61 }
  0x67   :  { %s1163_s12 = sld [smem:[#allocation2 + $0x187]]  ;;  %v283_v40 = vmul.f32 %v1089_v6, %v282_v30 }
  0x68   :  { %s1175_s15 = sld [smem:[#allocation2 + $0x189]]  ;;  %v257_v46 = vadd.f32 %v256_v28, %v234_v27 }
  0x69   :  { %s1178_s24 = sld [smem:[#allocation2 + $0x18a]]  ;;  %v309_v48 = vstv %s1146_s6 }
  0x6a   :  { %1764 = sst [smem:[#allocation19_spill]] %s1149_s9  ;;  %v310_v58 = vmul.f32 %v1104_v10, %v309_v48  ;;  %v284_v1 = vadd.f32 %v283_v40, %v257_v46 }
  0x6b   :  { %s1166_s9 = sld [smem:[#allocation2 + $0x188]]  ;;  %v363_v25 = vstv %s1158_s14 }
  0x6c   :  { %s1192_s16 = sld [smem:[#allocation2 + $0x201]]  ;;  %v311_v23 = vadd.f32 %v310_v58, %v284_v1 }
  0x6d   :  { %1765 = sst [smem:[#allocation20_spill]] %s1163_s12 }
  0x6e   :  { %1767 = sst [smem:[#allocation22_spill]] %s1175_s15 }
  0x6f   :  { %1768 = sst [smem:[#allocation23_spill]] %s1178_s24 }
  0x70   :  { %s1180_s12 = sld [smem:[#allocation2 + $0x18b]] }
  0x71   :  { %1766 = sst [smem:[#allocation21_spill]] %s1166_s9 }
  0x72   :  { %s1183_s9 = sld [smem:[#allocation2 + $0x200]]  ;;  %v258_v33 = vstv %s1192_s16 }
  0x73   :  { %s1195_s25 = sld [smem:[#allocation2 + $0x202]]  ;;  %v259_v47 = vmul.f32 %v1074_v2, %v258_v33 }
  0x74   :  { %s1200_s24 = sld [smem:[#allocation2 + $0x204]] }
  0x75   :  { %s1210_s17 = sld [smem:[#allocation2 + $0x205]] }
  0x76   :  { %1769 = sst [smem:[#allocation24_spill]] %s1180_s12 }
  0x77   :  { %s1197_s12 = sld [smem:[#allocation2 + $0x203]] }
  0x78   :  { %s1214_s26 = sld [smem:[#allocation2 + $0x206]]  ;;  %v235_v32 = vstv %s1183_s9 }
  0x79   :  { %s1216_s15 = sld [smem:[#allocation2 + $0x207]]  ;;  %v236_v45 = vmul.f32 %v235_v32, %v1069_v0  ;;  %v285_v49 = vstv %s1195_s25 }
  0x7a   :  { %s1221_s1 = sld [smem:[#allocation2 + $0x208]]  ;;  %v286_v3 = vmul.f32 %v1089_v6, %v285_v49  ;;  %v339_v30 = vstv %s1200_s24 }
  0x7b   :  { %s1231_s10 = sld [smem:[#allocation2 + $0x209]]  ;;  %v260_v62 = vadd.f32 %v259_v47, %v236_v45  ;;  %v390_v45 = vstv %s1161_s23  ;;  %v366_v48 = vstv %s1210_s17 }
  0x7c   :  { %s1234_s19 = sld [smem:[#allocation2 + $0x20a]] }
  0x7d   :  { %s1236_s13 = sld [smem:[#allocation2 + $0x20b]]  ;;  %v312_v8 = vstv %s1197_s12  ;;  %v287_v21 = vadd.f32 %v286_v3, %v260_v62  ;;  %v367_v62 = vmul.f32 %v1138_v22, %v366_v48 }
  0x7e   :  { %s1773_s0 = sld [smem:[#allocation12_spill]]  ;;  %v313_v24 = vmul.f32 %v1104_v10, %v312_v8 }
  0x7f   :  { %s1241_s7 = sld [smem:[#allocation2 + $0x280]] }
  0x80   :  { %s1774_s2 = sld [smem:[#allocation13_spill]] }
  0x81   :  { %1770 = sst [smem:[#allocation25_spill]] %s1231_s10 }
  0x82   :  { %1771 = sst [smem:[#allocation26_spill]] %s1234_s19 }
  0x83   :  { %1772 = sst [smem:[#allocation27_spill]] %s1236_s13 }
  0x84   :  { %s1250_s13 = sld [smem:[#allocation2 + $0x281]]  ;;  %v465_v19 = vstv %s1773_s0 }
  0x85   :  { %s1253_s19 = sld [smem:[#allocation2 + $0x282]]  ;;  %v466_v34 = vmul.f32 %v1207_v51, %v465_v19  ;;  %v237_v54 = vstv %s1241_s7 }
  0x86   :  { %s1775_s20 = sld [smem:[#allocation15_spill]]  ;;  %v492_v26 = vstv %s1774_s2  ;;  %v238_v5 = vmul.f32 %v237_v54, %v1069_v0 }
  0x87   :  { %s1257_s10 = sld [smem:[#allocation2 + $0x283]]  ;;  %v493_v37 = vmul.f32 %v1229_v63, %v492_v26  ;;  %v467_v60 = vadd.f32 %v466_v34, %v440_v44  ;;  %v340_v44 = vmul.f32 %v1119_v14, %v339_v30 }
  0x88   :  { %s1262_s4 = sld [smem:[#allocation2 + $0x284]] }
  0x89   :  { %s1776_s27 = sld [smem:[#allocation14_spill]]  ;;  %v494_v19 = vadd.f32 %v493_v37, %v467_v60 }
  0x8a   :  { %s1266_s8 = sld [smem:[#allocation2 + $0x285]]  ;;  %v261_v55 = vstv %s1250_s13 }
  0x8b   :  { %s1272_s30 = sld [smem:[#allocation2 + $0x286]]  ;;  %v262_v7 = vmul.f32 %v1074_v2, %v261_v55  ;;  %v288_v11 = vstv %s1253_s19 }
  0x8c   :  { %v333_v31 = vstv %s1775_s20  ;;  %s1277_s21 = sld [smem:[#allocation2 + $0x287]]  ;;  %v289_v28 = vmul.f32 %v1089_v6, %v288_v11 }
  0x8d   :  { %s1284_s0 = sld [smem:[#allocation2 + $0x288]]  ;;  %v334_v42 = vmul.f32 %v1119_v14, %v333_v31  ;;  %v263_v27 = vadd.f32 %v262_v7, %v238_v5  ;;  %v315_v33 = vstv %s1257_s10  ;;  %v420_v5 = vstv %s1216_s15 }
  0x8e   :  { %s1777_s9 = sld [smem:[#allocation16_spill]]  ;;  %v316_v47 = vmul.f32 %v1104_v10, %v315_v33  ;;  %v342_v54 = vstv %s1262_s4 }
  0x8f   :  { %v519_v39 = vstv %s1776_s27  ;;  %s1288_s22 = sld [smem:[#allocation2 + $0x289]]  ;;  %v335_v59 = vadd.f32 %v334_v42, %v308_v41  ;;  %v314_v41 = vadd.f32 %v313_v24, %v287_v21  ;;  %v290_v46 = vadd.f32 %v289_v28, %v263_v27 }
  0x90   :  { %s1293_s11 = sld [smem:[#allocation2 + $0x28a]]  ;;  %v1299_v53 = vmul.f32 %v1248_v13, %v519_v39  ;;  %v364_v39 = vmul.f32 %v1138_v22, %v363_v25  ;;  %v343_v3 = vmul.f32 %v1119_v14, %v342_v54  ;;  %v421_v24 = vmul.f32 %v1172_v36, %v420_v5 }
  0x91   :  { %s1778_s16 = sld [smem:[#allocation19_spill]]  ;;  %v362_v18 = vadd.f32 %v361_v50, %v335_v59  ;;  %v341_v60 = vadd.f32 %v340_v44, %v314_v41  ;;  %v396_v27 = vstv %s1272_s30 }
  0x92   :  { %s1301_s29 = sld [smem:[#allocation2 + $0x28b]]  ;;  %v1371_v55 = vadd.f32 %v1299_v53, %v494_v19  ;;  %v317_v53 = vadd.f32 %v316_v47, %v290_v46 }
  0x93   :  { %s1307_s18 = sld [smem:[#allocation2 + $0x300]]  ;;  %v389_v40 = vadd.f32 %v388_v9, %v362_v18  ;;  %v369_v9 = vstv %s1266_s8 }
  0x94   :  { %v441_v57 = vstv %s1777_s9  ;;  %s1311_s3 = sld [smem:[#allocation2 + $0x301]] }
  0x95   :  { %s1779_s6 = sld [smem:[#allocation17_spill]]  ;;  %v1326_v15 = vmul.f32 %v1189_v43, %v441_v57  ;;  %v391_v57 = vmul.f32 %v1155_v29, %v390_v45  ;;  %v416_v58 = vadd.f32 %v415_v12, %v389_v40 }
  0x96   :  { %s1315_s25 = sld [smem:[#allocation2 + $0x302]] }
  0x97   :  { %v336_v4 = vstv %s1778_s16  ;;  %s1321_s28 = sld [smem:[#allocation2 + $0x303]]  ;;  %v1399_v18 = vadd.f32 %v1326_v15, %v416_v58  ;;  %v370_v15 = vmul.f32 %v1138_v22, %v369_v9 }
  0x98   :  { %s1331_s5 = sld [smem:[#allocation2 + $0x304]]  ;;  %v337_v17 = vmul.f32 %v1119_v14, %v336_v4  ;;  %v393_v4 = vstv %s1214_s26 }
  0x99   :  { %s1335_s12 = sld [smem:[#allocation2 + $0x305]]  ;;  %v239_v26 = vstv %s1307_s18 }
  0x9a   :  { %s1339_s19 = sld [smem:[#allocation2 + $0x306]]  ;;  %v240_v31 = vmul.f32 %v239_v26, %v1069_v0  ;;  %v264_v32 = vstv %s1311_s3  ;;  %v338_v42 = vadd.f32 %v337_v17, %v311_v23  ;;  %v394_v23 = vmul.f32 %v1155_v29, %v393_v4 }
  0x9b   :  { %v495_v20 = vstv %s1779_s6  ;;  %s1344_s13 = sld [smem:[#allocation2 + $0x307]]  ;;  %v265_v35 = vmul.f32 %v1074_v2, %v264_v32  ;;  %v344_v26 = vadd.f32 %v343_v3, %v317_v53  ;;  %v450_v4 = vstv %s1284_s0 }
  0x9c   :  { %s1780_s7 = sld [smem:[#allocation18_spill]]  ;;  %v1350_v34 = vmul.f32 %v1229_v63, %v495_v20  ;;  %v291_v37 = vstv %s1315_s25  ;;  %v365_v61 = vadd.f32 %v364_v39, %v338_v42  ;;  %v368_v20 = vadd.f32 %v367_v62, %v341_v60 }
  0x9d   :  { %s1352_s14 = sld [smem:[#allocation2 + $0x308]]  ;;  %v266_v50 = vadd.f32 %v265_v35, %v240_v31  ;;  %v292_v52 = vmul.f32 %v1089_v6, %v291_v37  ;;  %v318_v56 = vstv %s1321_s28  ;;  %v447_v39 = vstv %s1221_s1 }
  0x9e   :  { %s1357_s24 = sld [smem:[#allocation2 + $0x309]]  ;;  %v319_v8 = vmul.f32 %v1104_v10, %v318_v56  ;;  %v345_v12 = vstv %s1331_s5  ;;  %v392_v21 = vadd.f32 %v391_v57, %v365_v61  ;;  %v423_v42 = vstv %s1277_s21 }
  0x9f   :  { %s1781_s10 = sld [smem:[#allocation20_spill]]  ;;  %v293_v7 = vadd.f32 %v292_v52, %v266_v50  ;;  %v346_v32 = vmul.f32 %v1119_v14, %v345_v12  ;;  %v372_v37 = vstv %s1335_s12  ;;  %v371_v46 = vadd.f32 %v370_v15, %v344_v26 }
  0xa0   :  { %s1361_s2 = sld [smem:[#allocation2 + $0x30a]]  ;;  %v373_v48 = vmul.f32 %v1138_v22, %v372_v37  ;;  %v399_v54 = vstv %s1339_s19  ;;  %v424_v56 = vmul.f32 %v1172_v36, %v423_v42  ;;  %v448_v57 = vmul.f32 %v1189_v43, %v447_v39 }
  0xa1   :  { %s1782_s20 = sld [smem:[#allocation21_spill]]  ;;  %v320_v31 = vadd.f32 %v319_v8, %v293_v7  ;;  %v400_v53 = vmul.f32 %v1155_v29, %v399_v54  ;;  %v426_v7 = vstv %s1344_s13 }
  0xa2   :  { %v522_v49 = vstv %s1780_s7  ;;  %s1366_s27 = sld [smem:[#allocation2 + $0x30b]]  ;;  %v427_v26 = vmul.f32 %v1172_v36, %v426_v7 }
  0xa3   :  { %s1373_s23 = sld [smem:[#allocation2 + $0x380]]  ;;  %v1392_v11 = vmul.f32 %v1248_v13, %v522_v49  ;;  %v347_v47 = vadd.f32 %v346_v32, %v320_v31  ;;  %v395_v49 = vadd.f32 %v394_v23, %v368_v20 }
  0xa4   :  { %s1378_s17 = sld [smem:[#allocation2 + $0x381]] }
  0xa5   :  { %v417_v59 = vstv %s1781_s10  ;;  %s1382_s4 = sld [smem:[#allocation2 + $0x382]]  ;;  %v422_v3 = vadd.f32 %v421_v24, %v395_v49 }
  0xa6   :  { %s1387_s9 = sld [smem:[#allocation2 + $0x383]]  ;;  %v418_v17 = vmul.f32 %v1172_v36, %v417_v59 }
  0xa7   :  { %v444_v1 = vstv %s1782_s20  ;;  %s1394_s16 = sld [smem:[#allocation2 + $0x384]]  ;;  %v449_v15 = vadd.f32 %v448_v57, %v422_v3 }
  0xa8   :  { %v445_v19 = vmul.f32 %v1189_v43, %v444_v1  ;;  %s1402_s15 = sld [smem:[#allocation2 + $0x385]]  ;;  %v374_v1 = vadd.f32 %v373_v48, %v347_v47 }
  0xa9   :  { %s1406_s26 = sld [smem:[#allocation2 + $0x386]]  ;;  %v241_v25 = vstv %s1373_s23 }
  0xaa   :  { %s1411_s8 = sld [smem:[#allocation2 + $0x387]]  ;;  %v242_v28 = vmul.f32 %v241_v25, %v1069_v0  ;;  %v267_v30 = vstv %s1378_s17  ;;  %v397_v0 = vmul.f32 %v1155_v29, %v396_v27  ;;  %v401_v25 = vadd.f32 %v400_v53, %v374_v1 }
  0xab   :  { %s1416_s18 = sld [smem:[#allocation2 + $0x388]]  ;;  %v268_v33 = vmul.f32 %v1074_v2, %v267_v30  ;;  %v294_v35 = vstv %s1382_s4  ;;  %v453_v27 = vstv %s1352_s14 }
  0xac   :  { %s1422_s3 = sld [smem:[#allocation2 + $0x389]]  ;;  %v295_v40 = vmul.f32 %v1089_v6, %v294_v35  ;;  %v321_v41 = vstv %s1387_s9  ;;  %v398_v62 = vadd.f32 %v397_v0, %v371_v46  ;;  %v454_v0 = vmul.f32 %v1189_v43, %v453_v27 }
  0xad   :  { %s1428_s30 = sld [smem:[#allocation2 + $0x38a]]  ;;  %v269_v44 = vadd.f32 %v268_v33, %v242_v28  ;;  %v322_v45 = vmul.f32 %v1104_v10, %v321_v41  ;;  %v348_v2 = vstv %s1394_s16  ;;  %v419_v10 = vadd.f32 %v418_v17, %v392_v21 }
  0xae   :  { %s1783_s6 = sld [smem:[#allocation22_spill]]  ;;  %v375_v6 = vstv %s1402_s15  ;;  %v349_v52 = vmul.f32 %v1119_v14, %v348_v2  ;;  %v425_v23 = vadd.f32 %v424_v56, %v398_v62  ;;  %v470_v28 = vadd.f32 %v1329_v16, %v1399_v18 }
  0xaf   :  { %s1784_s25 = sld [smem:[#allocation25_spill]]  ;;  %v296_v50 = vadd.f32 %v295_v40, %v269_v44  ;;  %v376_v61 = vmul.f32 %v1138_v22, %v375_v6  ;;  %v402_v14 = vstv %s1406_s26  ;;  %v446_v8 = vadd.f32 %v445_v19, %v419_v10 }
  0xb0   :  { %s1432_s28 = sld [smem:[#allocation2 + $0x38b]]  ;;  %v403_v9 = vmul.f32 %v1155_v29, %v402_v14  ;;  %v429_v24 = vstv %s1411_s8  ;;  %v451_v19 = vmul.f32 %v1189_v43, %v450_v4  ;;  %v477_v29 = vstv %s1288_s22 }
  0xb1   :  { %s1436_s1 = sld [smem:[#allocation4]]  ;;  %v323_v60 = vadd.f32 %v322_v45, %v296_v50  ;;  %v430_v33 = vmul.f32 %v1172_v36, %v429_v24  ;;  %v456_v40 = vstv %s1416_s18  ;;  %v478_v16 = vmul.f32 %v1207_v51, %v477_v29 }
  0xb2   :  { %s1440_s21 = sld [smem:[#allocation4 + $0x1]]  ;;  %v452_v39 = vadd.f32 %v451_v19, %v425_v23  ;;  %v428_v41 = vadd.f32 %v427_v26, %v401_v25  ;;  %v504_v36 = vstv %s1293_s11  ;;  %v480_v44 = vstv %s1357_s24 }
  0xb3   :  { %s1446_s5 = sld [smem:[#allocation4 + $0x2]]  ;;  %v350_v5 = vadd.f32 %v349_v52, %v323_v60  ;;  %v497_v45 = vadd.f32 %v1350_v34, %v470_v28  ;;  %v457_v48 = vmul.f32 %v1189_v43, %v456_v40  ;;  %v483_v52 = vstv %s1422_s3 }
  0xb4   :  { %v471_v58 = vstv %s1783_s6  ;;  %s1785_s12 = sld [smem:[#allocation23_spill]]  ;;  %v479_v50 = vadd.f32 %v478_v16, %v452_v39  ;;  %v505_v54 = vmul.f32 %v1229_v63, %v504_v36  ;;  %v455_v10 = vadd.f32 %v454_v0, %v428_v41 }
  0xb5   :  { %v474_v59 = vstv %s1784_s25  ;;  %s1786_s7 = sld [smem:[#allocation26_spill]]  ;;  %v472_v22 = vmul.f32 %v1207_v51, %v471_v58  ;;  %v377_v21 = vadd.f32 %v376_v61, %v350_v5  ;;  %v481_v56 = vmul.f32 %v1207_v51, %v480_v44 }
  0xb6   :  { %s1450_s19 = sld [smem:[#allocation4 + $0x3]]  ;;  %v475_v12 = vmul.f32 %v1207_v51, %v474_v59  ;;  %v531_v58 = vstv %s1301_s29  ;;  %v507_v43 = vstv %s1361_s2  ;;  %v524_v59 = vadd.f32 %v1392_v11, %v497_v45 }
  0xb7   :  { %s1454_s10 = sld [smem:[#allocation4 + $0x4]]  ;;  %v473_v30 = vadd.f32 %v472_v22, %v446_v8  ;;  %v404_v32 = vadd.f32 %v403_v9, %v377_v21  ;;  %v540_v6 = vstv %s1436_s1  ;;  %v484_v14 = vmul.f32 %v1207_v51, %v483_v52 }
  0xb8   :  { %s1458_s20 = sld [smem:[#allocation4 + $0x5]]  ;;  %v476_v42 = vadd.f32 %v475_v12, %v449_v15  ;;  %v543_v49 = vstv %s1440_s21  ;;  %v541_v60 = vadd.f32 %v540_v6, %v1281_v38  ;;  %v510_v1 = vstv %s1428_s30 }
  0xb9   :  { %s1464_s23 = sld [smem:[#allocation4 + $0x6]]  ;;  %v431_v47 = vadd.f32 %v430_v33, %v404_v32  ;;  %v544_v61 = vadd.f32 %v543_v49, %v1371_v55  ;;  %v546_v53 = vstv %s1446_s5  ;;  %v506_v3 = vadd.f32 %v505_v54, %v479_v50 }
  0xba   :  { %v498_v17 = vstv %s1785_s12  ;;  %s1787_s0 = sld [smem:[#allocation24_spill]]  ;;  %v532_v11 = vmul.f32 %v1248_v13, %v531_v58  ;;  %v482_v38 = vadd.f32 %v481_v56, %v455_v10  ;;  %v508_v55 = vmul.f32 %v1229_v63, %v507_v43 }
  0xbb   :  { %v501_v20 = vstv %s1786_s7  ;;  %s1468_s13 = sld [smem:[#allocation4 + $0x7]]  ;;  %v499_v31 = vmul.f32 %v1229_v63, %v498_v17  ;;  %v458_v62 = vadd.f32 %v457_v48, %v431_v47  ;;  %v534_v51 = vstv %s1366_s27 }
  0xbc   :  { %s1788_s17 = sld [smem:[#allocation27_spill]]  ;;  %v502_v35 = vmul.f32 %v1229_v63, %v501_v20  ;;  %v511_v7 = vmul.f32 %v1229_v63, %v510_v1  ;;  %v1532_v8 = vmax.f32 %v541_v60, 0.0  ;;  %v1534_v22 = vmax.f32 %v544_v61, 0.0 }
  0xbd   :  { %s1472_s4 = sld [smem:[#allocation6]]  ;;  %v500_v2 = vadd.f32 %v499_v31, %v473_v30  ;;  %v547_v9 = vadd.f32 %v546_v53, %v524_v59  ;;  %v485_v12 = vadd.f32 %v484_v14, %v458_v62  ;;  %v549_v17 = vstv %s1450_s19 }
  0xbe   :  { %s1478_s9 = sld [smem:[#allocation6 + $0x1]]  ;;  %v503_v57 = vadd.f32 %v502_v35, %v476_v42  ;;  %v533_v23 = vadd.f32 %v532_v11, %v506_v3  ;;  %v537_v24 = vstv %s1432_s28  ;;  %v552_v19 = vstv %s1454_s10 }
  0xbf   :  { %s1483_s22 = sld [smem:[#allocation6 + $0x2]]  ;;  %v509_v63 = vadd.f32 %v508_v55, %v482_v38  ;;  %v535_v25 = vmul.f32 %v1248_v13, %v534_v51  ;;  %v1552_v29 = vmax.f32 %v547_v9, 0.0  ;;  %v512_v31 = vadd.f32 %v511_v7, %v485_v12 }
  0xc0   :  { %v525_v37 = vstv %s1787_s0  ;;  %s1488_s14 = sld [smem:[#allocation6 + $0x3]]  ;;  %v538_v32 = vmul.f32 %v1248_v13, %v537_v24 }
  0xc1   :  { %s1492_s16 = sld [smem:[#allocation6 + $0x4]]  ;;  %v526_v46 = vmul.f32 %v1248_v13, %v525_v37  ;;  %v555_v37 = vstv %s1458_s20  ;;  %v536_v16 = vadd.f32 %v535_v25, %v509_v63 }
  0xc2   :  { %v528_v18 = vstv %s1788_s17  ;;  %s1497_s15 = sld [smem:[#allocation6 + $0x5]]  ;;  %v539_v36 = vadd.f32 %v538_v32, %v512_v31  ;;  %v556_v45 = vadd.f32 %v555_v37, %v533_v23 }
  0xc3   :  { %s1502_s26 = sld [smem:[#allocation6 + $0x6]]  ;;  %v529_v34 = vmul.f32 %v1248_v13, %v528_v18  ;;  %v527_v4 = vadd.f32 %v526_v46, %v500_v2  ;;  %v564_v20 = vstv %s1472_s4  ;;  %v558_v13 = vstv %s1464_s23 }
  0xc4   :  { %s1507_s11 = sld [smem:[#allocation6 + $0x7]]  ;;  %v566_v21 = vstv %s1478_s9  ;;  %v565_v28 = vmul.f32 %v564_v20, %v1532_v8  ;;  %v561_v46 = vstv %s1468_s13  ;;  %v559_v49 = vadd.f32 %v558_v13, %v536_v16 }
  0xc5   :  { %s1511_s24 = sld [smem:[#allocation6 + $0x80]]  ;;  %v530_v5 = vadd.f32 %v529_v34, %v503_v57  ;;  %v550_v27 = vadd.f32 %v549_v17, %v527_v4  ;;  %v567_v30 = vmul.f32 %v566_v21, %v1534_v22  ;;  %v569_v35 = vstv %s1483_s22 }
  0xc6   :  { %s1517_s8 = sld [smem:[#allocation6 + $0x81]]  ;;  %v570_v42 = vmul.f32 %v569_v35, %v1552_v29  ;;  %v572_v2 = vstv %s1488_s14  ;;  %v1596_v58 = vmax.f32 %v556_v45, 0.0  ;;  %v562_v43 = vadd.f32 %v561_v46, %v539_v36 }
  0xc7   :  { %s1522_s18 = sld [smem:[#allocation6 + $0x82]]  ;;  %v553_v33 = vadd.f32 %v552_v19, %v530_v5  ;;  %v1570_v41 = vmax.f32 %v550_v27, 0.0  ;;  %v568_v0 = vadd.f32 %v567_v30, %v565_v28  ;;  %v575_v59 = vstv %s1492_s16 }
  0xc8   :  { %s1525_s29 = sld [smem:[#allocation6 + $0x83]]  ;;  %v578_v60 = vstv %s1497_s15  ;;  %v1609_v3 = vmax.f32 %v559_v49, 0.0  ;;  %v1615_v55 = vmax.f32 %v562_v43, 0.0 }
  0xc9   :  { %s1529_s2 = sld [smem:[#allocation6 + $0x84]]  ;;  %v1576_v44 = vmax.f32 %v553_v33, 0.0  ;;  %v571_v34 = vadd.f32 %v570_v42, %v568_v0  ;;  %v573_v10 = vmul.f32 %v572_v2, %v1570_v41  ;;  %v579_v5 = vmul.f32 %v578_v60, %v1596_v58 }
  0xca   :  { %s1536_s3 = sld [smem:[#allocation6 + $0x85]]  ;;  %v581_v51 = vstv %s1502_s26  ;;  %v584_v7 = vstv %s1507_s11 }
  0xcb   :  { %s1541_s30 = sld [smem:[#allocation6 + $0x86]]  ;;  %v591_v26 = vstv %s1511_s24  ;;  %v574_v4 = vadd.f32 %v573_v10, %v571_v34  ;;  %v576_v11 = vmul.f32 %v575_v59, %v1576_v44  ;;  %v582_v16 = vmul.f32 %v581_v51, %v1609_v3 }
  0xcc   :  { %s1545_s27 = sld [smem:[#allocation6 + $0x87]]  ;;  %v593_v15 = vstv %s1517_s8  ;;  %v592_v39 = vmul.f32 %v591_v26, %v1532_v8 }
  0xcd   :  { %s1550_s6 = sld [smem:[#allocation6 + $0x100]]  ;;  %v594_v40 = vmul.f32 %v593_v15, %v1534_v22  ;;  %v596_v18 = vstv %s1522_s18  ;;  %v577_v63 = vadd.f32 %v576_v11, %v574_v4 }
  0xce   :  { %s1556_s25 = sld [smem:[#allocation6 + $0x101]]  ;;  %v597_v48 = vmul.f32 %v596_v18, %v1552_v29  ;;  %v599_v50 = vstv %s1525_s29  ;;  %v1652_v18 = vmul.f32 %v584_v7, %v1615_v55 }
  0xcf   :  { %s1560_s28 = sld [smem:[#allocation6 + $0x102]]  ;;  %v595_v47 = vadd.f32 %v594_v40, %v592_v39  ;;  %v600_v62 = vmul.f32 %v599_v50, %v1570_v41  ;;  %v602_v14 = vstv %s1529_s2  ;;  %v580_v42 = vadd.f32 %v579_v5, %v577_v63 }
  0xd0   :  { %s1565_s1 = sld [smem:[#allocation6 + $0x103]]  ;;  %v603_v12 = vmul.f32 %v602_v14, %v1576_v44  ;;  %v605_v17 = vstv %s1536_s3 }
  0xd1   :  { %s1568_s21 = sld [smem:[#allocation6 + $0x104]]  ;;  %v598_v61 = vadd.f32 %v597_v48, %v595_v47  ;;  %v606_v27 = vmul.f32 %v605_v17, %v1596_v58  ;;  %v608_v28 = vstv %s1541_s30  ;;  %v583_v4 = vadd.f32 %v582_v16, %v580_v42 }
  0xd2   :  { %s1574_s5 = sld [smem:[#allocation6 + $0x105]]  ;;  %v609_v36 = vmul.f32 %v608_v28, %v1609_v3  ;;  %v611_v45 = vstv %s1545_s27 }
  0xd3   :  { %s1579_s12 = sld [smem:[#allocation6 + $0x106]]  ;;  %v619_v6 = vstv %s1550_s6  ;;  %v601_v9 = vadd.f32 %v600_v62, %v598_v61  ;;  %v612_v51 = vmul.f32 %v611_v45, %v1615_v55 }
  0xd4   :  { %s1584_s7 = sld [smem:[#allocation6 + $0x107]]  ;;  %v620_v52 = vmul.f32 %v619_v6, %v1532_v8  ;;  %v621_v54 = vstv %s1556_s25 }
  0xd5   :  { %s1589_s19 = sld [smem:[#allocation6 + $0x180]]  ;;  %v622_v56 = vmul.f32 %v621_v54, %v1534_v22  ;;  %v624_v57 = vstv %s1560_s28  ;;  %v604_v32 = vadd.f32 %v603_v12, %v601_v9 }
  0xd6   :  { %s1594_s10 = sld [smem:[#allocation6 + $0x181]]  ;;  %v625_v53 = vmul.f32 %v624_v57, %v1552_v29  ;;  %v627_v38 = vstv %s1565_s1 }
  0xd7   :  { %s1599_s20 = sld [smem:[#allocation6 + $0x182]]  ;;  %v623_v1 = vadd.f32 %v622_v56, %v620_v52  ;;  %v628_v23 = vmul.f32 %v627_v38, %v1570_v41  ;;  %v630_v25 = vstv %s1568_s21  ;;  %v607_v46 = vadd.f32 %v606_v27, %v604_v32 }
  0xd8   :  { %s1603_s23 = sld [smem:[#allocation6 + $0x183]]  ;;  %v631_v40 = vmul.f32 %v630_v25, %v1576_v44  ;;  %v633_v13 = vstv %s1574_s5 }
  0xd9   :  { %s1607_s0 = sld [smem:[#allocation6 + $0x184]]  ;;  %v626_v21 = vadd.f32 %v625_v53, %v623_v1  ;;  %v634_v50 = vmul.f32 %v633_v13, %v1596_v58  ;;  %v636_v34 = vstv %s1579_s12  ;;  %v610_v17 = vadd.f32 %v609_v36, %v607_v46 }
  0xda   :  { %s1613_s13 = sld [smem:[#allocation6 + $0x185]]  ;;  %v639_v10 = vstv %s1584_s7  ;;  %v637_v38 = vmul.f32 %v636_v34, %v1609_v3 }
  0xdb   :  { %s1620_s17 = sld [smem:[#allocation6 + $0x186]]  ;;  %v647_v20 = vstv %s1589_s19  ;;  %v629_v39 = vadd.f32 %v628_v23, %v626_v21  ;;  %v613_v45 = vadd.f32 %v612_v51, %v610_v17 }
  0xdc   :  { %s1625_s4 = sld [smem:[#allocation6 + $0x187]]  ;;  %v648_v24 = vmul.f32 %v647_v20, %v1532_v8  ;;  %v649_v19 = vstv %s1594_s10  ;;  %v640_v20 = vmul.f32 %v639_v10, %v1615_v55 }
  0xdd   :  { %s1630_s9 = sld [smem:[#allocation6 + $0x200]]  ;;  %v650_v26 = vmul.f32 %v649_v19, %v1534_v22  ;;  %v652_v15 = vstv %s1599_s20  ;;  %v632_v49 = vadd.f32 %v631_v40, %v629_v39 }
  0xde   :  { %s1635_s22 = sld [smem:[#allocation6 + $0x201]]  ;;  %v653_v30 = vmul.f32 %v652_v15, %v1552_v29  ;;  %v655_v31 = vstv %s1603_s23 }
  0xdf   :  { %s1641_s14 = sld [smem:[#allocation6 + $0x202]]  ;;  %v651_v33 = vadd.f32 %v650_v26, %v648_v24  ;;  %v656_v35 = vmul.f32 %v655_v31, %v1570_v41  ;;  %v658_v37 = vstv %s1607_s0  ;;  %v635_v11 = vadd.f32 %v634_v50, %v632_v49 }
  0xe0   :  { %s1645_s16 = sld [smem:[#allocation6 + $0x203]]  ;;  %v659_v2 = vmul.f32 %v658_v37, %v1576_v44  ;;  %v661_v48 = vstv %s1613_s13 }
  0xe1   :  { %s1648_s15 = sld [smem:[#allocation6 + $0x204]]  ;;  %v654_v0 = vadd.f32 %v653_v30, %v651_v33  ;;  %v662_v59 = vmul.f32 %v661_v48, %v1596_v58  ;;  %v664_v62 = vstv %s1620_s17  ;;  %v638_v26 = vadd.f32 %v637_v38, %v635_v11 }
  0xe2   :  { %s1655_s26 = sld [smem:[#allocation6 + $0x205]]  ;;  %v665_v23 = vmul.f32 %v664_v62, %v1609_v3  ;;  %v667_v24 = vstv %s1625_s4 }
  0xe3   :  { %s1660_s11 = sld [smem:[#allocation6 + $0x206]]  ;;  %v657_v47 = vadd.f32 %v656_v35, %v654_v0  ;;  %v675_v6 = vstv %s1630_s9  ;;  %v668_v37 = vmul.f32 %v667_v24, %v1615_v55 }
  0xe4   :  { %s1664_s24 = sld [smem:[#allocation6 + $0x207]]  ;;  %v676_v52 = vmul.f32 %v675_v6, %v1532_v8  ;;  %v677_v54 = vstv %s1635_s22 }
  0xe5   :  { %s1669_s8 = sld [smem:[#allocation6 + $0x280]]  ;;  %v678_v56 = vmul.f32 %v677_v54, %v1534_v22  ;;  %v680_v57 = vstv %s1641_s14  ;;  %v660_v43 = vadd.f32 %v659_v2, %v657_v47  ;;  %v641_v47 = vadd.f32 %v640_v20, %v638_v26 }
  0xe6   :  { %s1675_s18 = sld [smem:[#allocation6 + $0x281]]  ;;  %v681_v60 = vmul.f32 %v680_v57, %v1552_v29  ;;  %v683_v61 = vstv %s1645_s16 }
  0xe7   :  { %s1680_s29 = sld [smem:[#allocation6 + $0x282]]  ;;  %v679_v14 = vadd.f32 %v678_v56, %v676_v52  ;;  %v684_v1 = vmul.f32 %v683_v61, %v1570_v41  ;;  %v686_v53 = vstv %s1648_s15  ;;  %v663_v21 = vadd.f32 %v662_v59, %v660_v43 }
  0xe8   :  { %s1685_s2 = sld [smem:[#allocation6 + $0x283]]  ;;  %v689_v5 = vstv %s1655_s26  ;;  %v687_v9 = vmul.f32 %v686_v53, %v1576_v44 }
  0xe9   :  { %s1689_s3 = sld [smem:[#allocation6 + $0x284]]  ;;  %v682_v7 = vadd.f32 %v681_v60, %v679_v14  ;;  %v692_v12 = vstv %s1660_s11  ;;  %v690_v63 = vmul.f32 %v689_v5, %v1596_v58  ;;  %v666_v35 = vadd.f32 %v665_v23, %v663_v21 }
  0xea   :  { %s1694_s30 = sld [smem:[#allocation6 + $0x285]]  ;;  %v693_v15 = vmul.f32 %v692_v12, %v1609_v3  ;;  %v695_v31 = vstv %s1664_s24 }
  0xeb   :  { %s1698_s27 = sld [smem:[#allocation6 + $0x286]]  ;;  %v685_v19 = vadd.f32 %v684_v1, %v682_v7  ;;  %v703_v25 = vstv %s1669_s8  ;;  %v696_v42 = vmul.f32 %v695_v31, %v1615_v55  ;;  %v669_v48 = vadd.f32 %v668_v37, %v666_v35 }
  0xec   :  { %s1703_s6 = sld [smem:[#allocation6 + $0x287]]  ;;  %v704_v27 = vmul.f32 %v703_v25, %v1532_v8  ;;  %v705_v28 = vstv %s1675_s18 }
  0xed   :  { %s1708_s25 = sld [smem:[#allocation7]]  ;;  %v688_v30 = vadd.f32 %v687_v9, %v685_v19  ;;  %v706_v32 = vmul.f32 %v705_v28, %v1534_v22  ;;  %v708_v33 = vstv %s1680_s29  ;;  %v586_v22 = vadd.f32 %v1652_v18, %v583_v4 }
  0xee   :  { %s903_s28 = sld [smem:[#allocation7 + $0x1]]  ;;  %v709_v39 = vmul.f32 %v708_v33, %v1552_v29  ;;  %v711_v40 = vstv %s1685_s2 }
  0xef   :  { %s904_s1 = sld [smem:[#allocation7 + $0x2]]  ;;  %v691_v16 = vadd.f32 %v690_v63, %v688_v30  ;;  %v707_v8 = vadd.f32 %v706_v32, %v704_v27  ;;  %v712_v13 = vmul.f32 %v711_v40, %v1570_v41  ;;  %v714_v0 = vstv %s1689_s3 }
  0xf0   :  { %s905_s21 = sld [smem:[#allocation7 + $0x3]]  ;;  %v717_v36 = vstv %s1694_s30  ;;  %v715_v46 = vmul.f32 %v714_v0, %v1576_v44 }
  0xf1   :  { %s906_s5 = sld [smem:[#allocation7 + $0x4]]  ;;  %v694_v2 = vadd.f32 %v693_v15, %v691_v16  ;;  %v710_v29 = vadd.f32 %v709_v39, %v707_v8  ;;  %v720_v6 = vstv %s1698_s27  ;;  %v718_v50 = vmul.f32 %v717_v36, %v1596_v58 }
  0xf2   :  { %s1722_s12 = sld [smem:[#allocation7 + $0x5]]  ;;  %v723_v52 = vstv %s1703_s6  ;;  %v721_v43 = vmul.f32 %v720_v6, %v1609_v3 }
  0xf3   :  { %v587_v41 = vstv %s1708_s25  ;;  %v713_v49 = vadd.f32 %v712_v13, %v710_v29  ;;  %v697_v34 = vadd.f32 %v696_v42, %v694_v2  ;;  %v724_v61 = vmul.f32 %v723_v52, %v1615_v55  ;;  %s1789_s10 = sld [smem:[#allocation28_spill]] }
  0xf4   :  { %v588_v18 = vadd.f32 %v587_v41, %v586_v22  ;;  %v614_v54 = vstv %s903_s28 }
  0xf5   :  { %v615_v10 = vadd.f32 %v614_v54, %v613_v45  ;;  %v642_v56 = vstv %s904_s1  ;;  %v716_v57 = vadd.f32 %v715_v46, %v713_v49 }
  0xf6   :  { %v589_v59 = vmax.f32 %v588_v18, 0.0  ;;  %v643_v44 = vadd.f32 %v642_v56, %v641_v47  ;;  %v670_v60 = vstv %s905_s21 }
  0xf7   :  { %v616_v62 = vmax.f32 %v615_v10, 0.0  ;;  %v671_v14 = vadd.f32 %v670_v60, %v669_v48  ;;  %v698_v1 = vstv %s906_s5  ;;  %v719_v53 = vadd.f32 %v718_v50, %v716_v57 }
  0xf8   :  { %v644_v58 = vmax.f32 %v643_v44, 0.0  ;;  %v699_v4 = vadd.f32 %v698_v1, %v697_v34  ;;  %v726_v38 = vstv %s1722_s12 }
  0xf9   :  { %590 = vst [vmem:[%s1789_s10] sm:$0xff] %v589_v59  ;;  %919 = vst [vmem:[%s1789_s10 + $0x8] sm:$0xff] %v616_v62  ;;  %v672_v3 = vmax.f32 %v671_v14, 0.0  ;;  %v722_v11 = vadd.f32 %v721_v43, %v719_v53 }
  0xfa   :  { %920 = vst [vmem:[%s1789_s10 + $0x10] sm:$0xff] %v644_v58  ;;  %v700_v55 = vmax.f32 %v699_v4, 0.0 }
  0xfb   :  { %921 = vst [vmem:[%s1789_s10 + $0x18] sm:$0xff] %v672_v3  ;;  %v725_v5 = vadd.f32 %v724_v61, %v722_v11 }
  0xfc   :  { %922 = vst [vmem:[%s1789_s10 + $0x20] sm:$0xff] %v700_v55 }
  0xfd   :  { %v727_v51 = vadd.f32 %v726_v38, %v725_v5 }
  0xff   :  { %v728_v7 = vmax.f32 %v727_v51, 0.0 }
 0x101   :  { %923 = vst [vmem:[%s1789_s10 + $0x28] sm:$0xff] %v728_v7 }
 0x102   :  { %735 = vsyncpa [#allocation3], 1 }
 0x103   :  { %736 = vsyncpa [#allocation5], 1 }
 0x104   :  { %737 = vsyncpa [#allocation8], 1 }

</bundles_post_ra>
